<compile_context>
chip_gen: v6e
topology: v6e:2x2x1
jax: 0.10.0
libtpu: 0.0.40
codegen_flags: <defaults>
</compile_context>

<pallas_src>
import numpy as np
import jax
import jax.numpy as jnp
from jax.experimental import pallas as pl
from jax.experimental.pallas import tpu as pltpu

MAX_NB = 15          # semantic limit (same as the PyTorch module)
NB_PAD = 16          # padded neighbor slots (multiple of 8 sublanes)
LANE = 128
HEAD_TILE = 128      # rows per grid step in the fused head/loss kernels
NEG_BIG = -1e9


# ----------------------------- Pallas kernels -----------------------------

def _gru_steps_kernel(xemb_ref, hnei_ref, onei_ref, outid_ref,
                      wzx_ref, wzh_ref, bz_ref,
                      wr_ref, br_ref, ur_ref,
                      whx_ref, whh_ref, bh_ref,
                      newh_ref, curo_ref, msg_ref):
    """One tree message-passing timestep per grid index.

    msg_ref is the resident directed-edge message table: slot 0 is a
    permanently-zero padding slot, the last slot is a trash slot for padded
    rows. Gathers / scatters are one-hot MXU matmuls (one-hot entries are
    exactly representable, so the gather is layout-only)."""
    t = pl.program_id(0)

    @pl.when(t == 0)
    def _init():
        msg_ref[...] = jnp.zeros_like(msg_ref)

    x = xemb_ref[0]            # (R, Hp)   node embeddings for this step
    hid = hnei_ref[0]          # (R*NB, 1) int32 edge ids (GRU input, parent excluded)
    oid = onei_ref[0]          # (R*NB, 1) int32 edge ids (all neighbors)
    out_id = outid_ref[0]      # (1, R)    int32 edge id written by each row
    msg = msg_ref[...]         # (E, Hp)   message table (state of steps < t)

    R, Hp = x.shape
    E = msg.shape[0]
    RNB = hid.shape[0]
    NB = RNB // R

    # ---- one-hot gathers of neighbor messages (MXU) ----
    col_e = jax.lax.broadcasted_iota(jnp.int32, (RNB, E), 1)
    h_sel = (col_e == hid).astype(jnp.float32)
    o_sel = (col_e == oid).astype(jnp.float32)
    h_nei = jnp.dot(h_sel, msg, preferred_element_type=jnp.float32)    # (RNB, Hp)
    o_nei = jnp.dot(o_sel, msg, preferred_element_type=jnp.float32)

    # group-sum (rows <- neighbor slots) and group-repeat matrices, no reshapes
    gr = jax.lax.broadcasted_iota(jnp.int32, (R, RNB), 0)
    gc = jax.lax.broadcasted_iota(jnp.int32, (R, RNB), 1)
    gsum = ((gc >= gr * NB) & (gc < (gr + 1) * NB)).astype(jnp.float32)   # (R, RNB)
    rr = jax.lax.broadcasted_iota(jnp.int32, (RNB, R), 0)
    rc = jax.lax.broadcasted_iota(jnp.int32, (RNB, R), 1)
    grep = ((rr >= rc * NB) & (rr < (rc + 1) * NB)).astype(jnp.float32)   # (RNB, R)

    sum_h = jnp.dot(gsum, h_nei, preferred_element_type=jnp.float32)      # (R, Hp)
    cur_o = jnp.dot(gsum, o_nei, preferred_element_type=jnp.float32)      # (R, Hp)

    # ---- GRU cell: all plain 2-D dots with pre-split weights ----
    z = jax.nn.sigmoid(
        jnp.dot(x, wzx_ref[...], preferred_element_type=jnp.float32)
        + jnp.dot(sum_h, wzh_ref[...], preferred_element_type=jnp.float32)
        + bz_ref[...])

    r1 = jnp.dot(x, wr_ref[...], preferred_element_type=jnp.float32) + br_ref[...]
    r2 = jnp.dot(h_nei, ur_ref[...], preferred_element_type=jnp.float32)  # (RNB, Hp)
    r1_rep = jnp.dot(grep, r1, preferred_element_type=jnp.float32)        # (RNB, Hp)
    r = jax.nn.sigmoid(r1_rep + r2)
    gated = jnp.dot(gsum, r * h_nei, preferred_element_type=jnp.float32)  # (R, Hp)

    pre_h = jnp.tanh(
        jnp.dot(x, whx_ref[...], preferred_element_type=jnp.float32)
        + jnp.dot(gated, whh_ref[...], preferred_element_type=jnp.float32)
        + bh_ref[...])

    new_h = (1.0 - z) * sum_h + z * pre_h                                  # (R, Hp)

    newh_ref[0] = new_h
    curo_ref[0] = cur_o

    # ---- scatter new messages into the edge table (unique slot per row) ----
    row_e = jax.lax.broadcasted_iota(jnp.int32, (E, R), 0)
    scat = (row_e == out_id).astype(jnp.float32)                           # (E, R)
    msg_ref[...] = msg + jnp.dot(scat, new_h, preferred_element_type=jnp.float32)


def _word_head_kernel(hid_ref, ctx_ref, tgt_ref,
                      wh_ref, wc_ref, bw_ref, wo_ref, bo_ref, acc_ref):
    """Fused word head: relu(W[h,ctx]) @ W_o, cross-entropy sum + correct count.

    acc[0,0] accumulates the CE sum, acc[0,1] the number of correct rows.
    Padded rows carry target == -1 and are masked out."""
    i = pl.program_id(0)

    @pl.when(i == 0)
    def _init():
        acc_ref[...] = jnp.zeros_like(acc_ref)

    h1 = jnp.maximum(
        jnp.dot(hid_ref[...], wh_ref[...], preferred_element_type=jnp.float32)
        + jnp.dot(ctx_ref[...], wc_ref[...], preferred_element_type=jnp.float32)
        + bw_ref[...], 0.0)
    s = jnp.dot(h1, wo_ref[...], preferred_element_type=jnp.float32) + bo_ref[...]

    t = tgt_ref[...]                                     # (TILE, 1) int32
    valid = t >= 0
    m = jnp.max(s, axis=-1, keepdims=True)               # padded vocab cols are ~-1e9
    lse = m + jnp.log(jnp.sum(jnp.exp(s - m), axis=-1, keepdims=True))
    col = jax.lax.broadcasted_iota(jnp.int32, s.shape, 1)
    picked = jnp.sum(jnp.where(col == t, s, 0.0), axis=-1, keepdims=True)
    ce = jnp.where(valid, lse - picked, 0.0)
    # "argmax == target"  <=>  target logit reaches the row max (ties negligible)
    corr = jnp.where(valid & (picked >= m), 1.0, 0.0)

    ce_sum = jnp.sum(ce)
    corr_sum = jnp.sum(corr)
    rows = jax.lax.broadcasted_iota(jnp.int32, acc_ref.shape, 0)
    cols = jax.lax.broadcasted_iota(jnp.int32, acc_ref.shape, 1)
    e0 = ((rows == 0) & (cols == 0)).astype(jnp.float32)
    e1 = ((rows == 0) & (cols == 1)).astype(jnp.float32)
    acc_ref[...] += ce_sum * e0 + corr_sum * e1


def _stop_head_kernel(x_ref, o_ref, ctx_ref, tgt_ref,
                      uix_ref, uio_ref, bi_ref,
                      uh_ref, uc_ref, bu_ref,
                      uo_ref, buo_ref, acc_ref):
    """Fused stop head: relu(U_i[x,o]), relu(U[.,ctx]), U_o as a lane
    reduction, BCE-with-logits sum + correct count. Padded rows: target -1."""
    i = pl.program_id(0)

    @pl.when(i == 0)
    def _init():
        acc_ref[...] = jnp.zeros_like(acc_ref)

    h1 = jnp.maximum(
        jnp.dot(x_ref[...], uix_ref[...], preferred_element_type=jnp.float32)
        + jnp.dot(o_ref[...], uio_ref[...], preferred_element_type=jnp.float32)
        + bi_ref[...], 0.0)
    h2 = jnp.maximum(
        jnp.dot(h1, uh_ref[...], preferred_element_type=jnp.float32)
        + jnp.dot(ctx_ref[...], uc_ref[...], preferred_element_type=jnp.float32)
        + bu_ref[...], 0.0)
    # final [H,1] projection as a lane reduction (avoids a 1-lane matmul output)
    score = jnp.sum(h2 * uo_ref[...], axis=-1, keepdims=True) + buo_ref[...]

    t = tgt_ref[...]                                     # (TILE, 1) f32, -1 == pad
    valid = t >= 0.0
    tt = jnp.where(valid, t, 0.0)
    bce = (jnp.maximum(score, 0.0) - score * tt
           + jnp.log(1.0 + jnp.exp(-jnp.abs(score))))
    bce = jnp.where(valid, bce, 0.0)
    stops = (score >= 0.0).astype(jnp.float32)
    corr = jnp.where(valid & (stops == tt), 1.0, 0.0)

    bce_sum = jnp.sum(bce)
    corr_sum = jnp.sum(corr)
    rows = jax.lax.broadcasted_iota(jnp.int32, acc_ref.shape, 0)
    cols = jax.lax.broadcasted_iota(jnp.int32, acc_ref.shape, 1)
    e0 = ((rows == 0) & (cols == 0)).astype(jnp.float32)
    e1 = ((rows == 0) & (cols == 1)).astype(jnp.float32)
    acc_ref[...] += bce_sum * e0 + corr_sum * e1


# ------------------------- tree stand-ins + dfs ----------------------------

class _Node:
    def __init__(self, idx, wid):
        self.idx = idx
        self.wid = wid
        self.neighbors = []


class _Tree:
    def __init__(self, nodes):
        self.nodes = nodes


def dfs(stack, x, fa_idx):
    for y in x.neighbors:
        if y.idx == fa_idx:
            continue
        stack.append((x, y, 1))
        dfs(stack, y, x.idx)
        stack.append((y, x, 0))


def build_tree(wids, edges, idx_offset):
    nodes = [_Node(idx_offset + i, w) for i, w in enumerate(wids)]
    for a, b in edges:
        nodes[a].neighbors.append(nodes[b])
        nodes[b].neighbors.append(nodes[a])
    return _Tree(nodes)


# ------------------------------ small helpers ------------------------------

def _ceil(a, b):
    return -(-a // b) * b


def _pad2d(a, shape, fill=0.0):
    out = jnp.full(shape, fill, jnp.float32)
    return out.at[: a.shape[0], : a.shape[1]].set(a)


def _pad_rows(a, n_rows, fill=0):
    pad = n_rows - a.shape[0]
    if pad == 0:
        return a
    return jnp.concatenate(
        [a, jnp.full((pad,) + a.shape[1:], fill, a.dtype)], axis=0)


# ------------------------------ the decoder --------------------------------

class JTNNDecoderPallas:
    def __init__(self, vocab_size, hidden_size, latent_size,
                 cond_lnKD_size, cond_SelectPtoM_size, key):
        self.vocab_size = vocab_size
        self.hidden_size = hidden_size
        self.ctx_size = latent_size + cond_lnKD_size + cond_SelectPtoM_size
        self.Hp = _ceil(hidden_size, LANE)
        self.Cp = _ceil(self.ctx_size, LANE)
        self.Vp = _ceil(vocab_size, LANE)

        H, C, V = hidden_size, self.ctx_size, vocab_size
        Hp, Cp, Vp = self.Hp, self.Cp, self.Vp
        keys = jax.random.split(key, 16)

        def lin(k, fi, fo):
            kw, kb = jax.random.split(k)
            return (jax.random.normal(kw, (fi, fo), jnp.float32) * 0.1,
                    jax.random.normal(kb, (1, fo), jnp.float32) * 0.1)

        emb = jax.random.normal(keys[0], (V, H), jnp.float32) * 0.1
        wz, bz = lin(keys[1], 2 * H, H)
        ur = jax.random.normal(keys[2], (H, H), jnp.float32) * 0.1   # no bias
        wr, br = lin(keys[3], H, H)
        wh, bh = lin(keys[4], 2 * H, H)
        ww, bw = lin(keys[5], H + C, H)
        uw, bu = lin(keys[6], H + C, H)
        ui, bi = lin(keys[7], 2 * H, H)
        wo, bo = lin(keys[8], H, V)
        uo, buo = lin(keys[9], H, 1)

        p = {}
        p['emb'] = _pad2d(emb, (V, Hp))
        # GRU (weights stored [in, out], pre-split, zero-padded to 128 lanes)
        p['Wz_x'] = _pad2d(wz[:H], (Hp, Hp))
        p['Wz_h'] = _pad2d(wz[H:], (Hp, Hp))
        p['bz'] = _pad2d(bz, (1, Hp))
        p['Wr'] = _pad2d(wr, (Hp, Hp))
        p['br'] = _pad2d(br, (1, Hp))
        p['Ur'] = _pad2d(ur, (Hp, Hp))
        p['Wh_x'] = _pad2d(wh[:H], (Hp, Hp))
        p['Wh_h'] = _pad2d(wh[H:], (Hp, Hp))
        p['bh'] = _pad2d(bh, (1, Hp))
        # word head
        p['Ww_h'] = _pad2d(ww[:H], (Hp, Hp))
        p['Ww_c'] = _pad2d(ww[H:], (Cp, Hp))
        p['bW'] = _pad2d(bw, (1, Hp))
        p['Wo'] = _pad2d(wo, (Hp, Vp))
        p['bWo'] = _pad2d(bo, (1, Vp), fill=NEG_BIG)   # padded classes -> -1e9
        # stop head
        p['Ui_x'] = _pad2d(ui[:H], (Hp, Hp))
        p['Ui_o'] = _pad2d(ui[H:], (Hp, Hp))
        p['bUi'] = _pad2d(bi, (1, Hp))
        p['Uw_h'] = _pad2d(uw[:H], (Hp, Hp))
        p['Uw_c'] = _pad2d(uw[H:], (Cp, Hp))
        p['bU'] = _pad2d(bu, (1, Hp))
        p['uo'] = _pad2d(uo.T, (1, Hp))                # [H,1] weight as a lane row
        p['buo'] = buo                                 # (1, 1)
        self.p = p

    # ---------------- host-side trace -> int32 step tables ----------------
    def _build_tables(self, tree_batch):
        traces = []
        for mol_tree in tree_batch:
            s = []
            dfs(s, mol_tree.nodes[0], -1)
            traces.append(s)
            for node in mol_tree.nodes:
                node.neighbors = []
        B = len(tree_batch)
        T = max((len(tr) for tr in traces), default=0)
        max_rows = max((sum(1 for tr in traces if t < len(tr))
                        for t in range(T)), default=0)
        R = max(8, _ceil(max_rows, 8))

        n_edges = sum(len(tr) for tr in traces)     # one directed edge per entry
        E_pad = max(8, _ceil(n_edges + 2, 8))       # slot 0: zero pad, last: trash
        trash = E_pad - 1

        wid_tab = np.zeros((T, R), np.int32)
        hnei_tab = np.zeros((T, R * NB_PAD, 1), np.int32)
        onei_tab = np.zeros((T, R * NB_PAD, 1), np.int32)
        out_tab = np.full((T, 1, R), trash, np.int32)

        edge_id = {}
        next_id = 1
        stop_rows, pred_rows = [], []
        for t in range(T):
            prop_list, batch_list = [], []
            for i, tr in enumerate(traces):
                if t < len(tr):
                    prop_list.append(tr[t])
                    batch_list.append(i)
            # reads use the neighbor lists / messages as of the end of step t-1
            for r, (node_x, real_y, _) in enumerate(prop_list):
                wid_tab[t, r] = node_x.wid
                h_ids = [edge_id[(ny.idx, node_x.idx)]
                         for ny in node_x.neighbors if ny.idx != real_y.idx]
                o_ids = [edge_id[(ny.idx, node_x.idx)] for ny in node_x.neighbors]
                assert len(o_ids) <= MAX_NB
                for k, e in enumerate(h_ids):
                    hnei_tab[t, r * NB_PAD + k, 0] = e
                for k, e in enumerate(o_ids):
                    onei_tab[t, r * NB_PAD + k, 0] = e
            # writes / bookkeeping happen after the whole step has been read
            for r, (node_x, node_y, direction) in enumerate(prop_list):
                eid = next_id
                next_id += 1
                edge_id[(node_x.idx, node_y.idx)] = eid
                out_tab[t, 0, r] = eid
                node_y.neighbors.append(node_x)
                if direction == 1:
                    pred_rows.append((t, r, batch_list[r], node_y.wid))
                stop_rows.append((t, r, batch_list[r], direction))

        root_wids = np.zeros((B,), np.int32)
        root_o_ids = np.zeros((B, NB_PAD), np.int32)
        for i, mol_tree in enumerate(tree_batch):
            root = mol_tree.nodes[0]
            root_wids[i] = root.wid
            ids = [edge_id[(ny.idx, root.idx)] for ny in root.neighbors]
            assert len(ids) <= MAX_NB
            root_o_ids[i, :len(ids)] = ids

        return dict(T=T, R=R, E_pad=E_pad, wid_tab=wid_tab, hnei_tab=hnei_tab,
                    onei_tab=onei_tab, out_tab=out_tab, stop_rows=stop_rows,
                    pred_rows=pred_rows, root_wids=root_wids,
                    root_o_ids=root_o_ids, batch_size=B)

    # ---------------- fused message-passing (single pallas_call) ----------
    def _run_message_passing(self, tabs):
        Hp = self.Hp
        T, R, E_pad = tabs['T'], tabs['R'], tabs['E_pad']
        RNB = R * NB_PAD
        x_emb_all = self.p['emb'][jnp.asarray(tabs['wid_tab'])]     # (T, R, Hp)
        wspec = lambda shape: pl.BlockSpec(shape, lambda t: (0, 0))
        newh, curo, msg = pl.pallas_call(
            _gru_steps_kernel,
            out_shape=(jax.ShapeDtypeStruct((T, R, Hp), jnp.float32),
                       jax.ShapeDtypeStruct((T, R, Hp), jnp.float32),
                       jax.ShapeDtypeStruct((E_pad, Hp), jnp.float32)),
            grid_spec=pltpu.PrefetchScalarGridSpec(
                num_scalar_prefetch=0, grid=(T,),
                in_specs=[
                    pl.BlockSpec((1, R, Hp), lambda t: (t, 0, 0)),
                    pl.BlockSpec((1, RNB, 1), lambda t: (t, 0, 0)),
                    pl.BlockSpec((1, RNB, 1), lambda t: (t, 0, 0)),
                    pl.BlockSpec((1, 1, R), lambda t: (t, 0, 0)),
                    wspec((Hp, Hp)), wspec((Hp, Hp)), wspec((1, Hp)),
                    wspec((Hp, Hp)), wspec((1, Hp)), wspec((Hp, Hp)),
                    wspec((Hp, Hp)), wspec((Hp, Hp)), wspec((1, Hp)),
                ],
                out_specs=[
                    pl.BlockSpec((1, R, Hp), lambda t: (t, 0, 0)),
                    pl.BlockSpec((1, R, Hp), lambda t: (t, 0, 0)),
                    pl.BlockSpec((E_pad, Hp), lambda t: (0, 0)),
                ]),
            compiler_params=pltpu.CompilerParams(
                dimension_semantics=("arbitrary",)),
        )(x_emb_all, jnp.asarray(tabs['hnei_tab']),
          jnp.asarray(tabs['onei_tab']), jnp.asarray(tabs['out_tab']),
          self.p['Wz_x'], self.p['Wz_h'], self.p['bz'],
          self.p['Wr'], self.p['br'], self.p['Ur'],
          self.p['Wh_x'], self.p['Wh_h'], self.p['bh'])
        return x_emb_all, newh, curo, msg

    # ---------------- fused head + loss kernels ----------------------------
    def _word_head(self, hid, ctx, tgt):
        Hp, Cp, Vp = self.Hp, self.Cp, self.Vp
        tiles = hid.shape[0] // HEAD_TILE
        wspec = lambda shape: pl.BlockSpec(shape, lambda i: (0, 0))
        acc = pl.pallas_call(
            _word_head_kernel,
            out_shape=jax.ShapeDtypeStruct((8, 128), jnp.float32),
            grid_spec=pltpu.PrefetchScalarGridSpec(
                num_scalar_prefetch=0, grid=(tiles,),
                in_specs=[
                    pl.BlockSpec((HEAD_TILE, Hp), lambda i: (i, 0)),
                    pl.BlockSpec((HEAD_TILE, Cp), lambda i: (i, 0)),
                    pl.BlockSpec((HEAD_TILE, 1), lambda i: (i, 0)),
                    wspec((Hp, Hp)), wspec((Cp, Hp)), wspec((1, Hp)),
                    wspec((Hp, Vp)), wspec((1, Vp)),
                ],
                out_specs=pl.BlockSpec((8, 128), lambda i: (0, 0))),
            compiler_params=pltpu.CompilerParams(
                dimension_semantics=("arbitrary",)),
        )(hid, ctx, tgt, self.p['Ww_h'], self.p['Ww_c'], self.p['bW'],
          self.p['Wo'], self.p['bWo'])
        return acc[0, 0], acc[0, 1]

    def _stop_head(self, x, o, ctx, tgt):
        Hp, Cp = self.Hp, self.Cp
        tiles = x.shape[0] // HEAD_TILE
        wspec = lambda shape: pl.BlockSpec(shape, lambda i: (0, 0))
        acc = pl.pallas_call(
            _stop_head_kernel,
            out_shape=jax.ShapeDtypeStruct((8, 128), jnp.float32),
            grid_spec=pltpu.PrefetchScalarGridSpec(
                num_scalar_prefetch=0, grid=(tiles,),
                in_specs=[
                    pl.BlockSpec((HEAD_TILE, Hp), lambda i: (i, 0)),
                    pl.BlockSpec((HEAD_TILE, Hp), lambda i: (i, 0)),
                    pl.BlockSpec((HEAD_TILE, Cp), lambda i: (i, 0)),
                    pl.BlockSpec((HEAD_TILE, 1), lambda i: (i, 0)),
                    wspec((Hp, Hp)), wspec((Hp, Hp)), wspec((1, Hp)),
                    wspec((Hp, Hp)), wspec((Cp, Hp)), wspec((1, Hp)),
                    wspec((1, Hp)), wspec((1, 1)),
                ],
                out_specs=pl.BlockSpec((8, 128), lambda i: (0, 0))),
            compiler_params=pltpu.CompilerParams(
                dimension_semantics=("arbitrary",)),
        )(x, o, ctx, tgt,
          self.p['Ui_x'], self.p['Ui_o'], self.p['bUi'],
          self.p['Uw_h'], self.p['Uw_c'], self.p['bU'],
          self.p['uo'], self.p['buo'])
        return acc[0, 0], acc[0, 1]

    # ---------------- forward ----------------------------------------------
    def forward(self, tree_batch, x_tree_vecs, mode='avg_loss'):
        # TODO(synk): only mode='avg_loss' implemented; 'indep_loss' needs a
        # per-tree scatter-add of the row losses (straightforward XLA, omitted).
        Hp, Cp = self.Hp, self.Cp
        tabs = self._build_tables(tree_batch)
        B = tabs['batch_size']
        T, R = tabs['T'], tabs['R']

        x_tree_pad = _pad2d(x_tree_vecs, (x_tree_vecs.shape[0], Cp))

        if T > 0:
            x_emb_all, newh, curo, msg = self._run_message_passing(tabs)
            newh_flat = newh.reshape(T * R, Hp)
            curo_flat = curo.reshape(T * R, Hp)
            xemb_flat = x_emb_all.reshape(T * R, Hp)
        else:
            newh_flat = jnp.zeros((0, Hp), jnp.float32)
            curo_flat = jnp.zeros((0, Hp), jnp.float32)
            xemb_flat = jnp.zeros((0, Hp), jnp.float32)
            msg = jnp.zeros((tabs['E_pad'], Hp), jnp.float32)

        # ---------------- word (label) prediction head ----------------
        pred_rows = tabs['pred_rows']
        pred_idx = np.array([t * R + r for (t, r, _, _) in pred_rows], np.int32)
        pred_ctx_idx = np.concatenate(
            [np.arange(B, dtype=np.int32),
             np.array([b for (_, _, b, _) in pred_rows], np.int32)])
        pred_tgt = np.concatenate(
            [tabs['root_wids'],
             np.array([w for (_, _, _, w) in pred_rows], np.int32)])
        n_pred = int(pred_tgt.shape[0])

        pred_hid = jnp.concatenate(
            [jnp.zeros((B, Hp), jnp.float32), newh_flat[jnp.asarray(pred_idx)]],
            axis=0)
        pred_ctx = x_tree_pad[jnp.asarray(pred_ctx_idx)]
        n_pad = _ceil(n_pred, HEAD_TILE)
        pred_hid = _pad_rows(pred_hid, n_pad, 0.0)
        pred_ctx = _pad_rows(pred_ctx, n_pad, 0.0)
        pred_tgt_d = _pad_rows(
            jnp.asarray(pred_tgt, jnp.int32).reshape(-1, 1), n_pad, -1)

        ce_sum, pred_corr = self._word_head(pred_hid, pred_ctx, pred_tgt_d)
        pred_loss = ce_sum / B
        pred_acc = pred_corr / n_pred

        # ---------------- stop (topology) prediction head ----------------
        stop_rows = tabs['stop_rows']
        stop_idx = np.array([t * R + r for (t, r, _, _) in stop_rows], np.int32)
        stop_ctx_idx = np.concatenate(
            [np.array([b for (_, _, b, _) in stop_rows], np.int32),
             np.arange(B, dtype=np.int32)])
        stop_tgt = np.concatenate(
            [np.array([float(d) for (_, _, _, d) in stop_rows], np.float32),
             np.zeros((B,), np.float32)])
        n_stop = int(stop_tgt.shape[0])

        root_x = self.p['emb'][jnp.asarray(tabs['root_wids'])]            # (B, Hp)
        root_o = jnp.sum(msg[jnp.asarray(tabs['root_o_ids'])], axis=1)    # (B, Hp)
        stop_x = jnp.concatenate(
            [xemb_flat[jnp.asarray(stop_idx)], root_x], axis=0)
        stop_o = jnp.concatenate(
            [curo_flat[jnp.asarray(stop_idx)], root_o], axis=0)
        stop_ctx = x_tree_pad[jnp.asarray(stop_ctx_idx)]
        n_pad = _ceil(n_stop, HEAD_TILE)
        stop_x = _pad_rows(stop_x, n_pad, 0.0)
        stop_o = _pad_rows(stop_o, n_pad, 0.0)
        stop_ctx = _pad_rows(stop_ctx, n_pad, 0.0)
        stop_tgt_d = _pad_rows(
            jnp.asarray(stop_tgt, jnp.float32).reshape(-1, 1), n_pad, -1.0)

        bce_sum, stop_corr = self._stop_head(stop_x, stop_o, stop_ctx, stop_tgt_d)
        stop_loss = bce_sum / B
        stop_acc = stop_corr / n_stop

        # TODO(synk): decode() (MAX_DECODE_LEN sampling loop) needs RDKit /
        # vocab SMILES, have_slots and can_assemble; no clean Pallas equivalent.
        # Accuracies are returned as device scalars (no host sync inside forward).
        return pred_loss, stop_loss, pred_acc, stop_acc


# --------------------------------- main ------------------------------------

if __name__ == "__main__":
    key = jax.random.PRNGKey(0)
    vocab_size, hidden, latent, c_lnKD, c_sel = 24, 32, 16, 8, 8
    kp, kv = jax.random.split(key)

    dec = JTNNDecoderPallas(vocab_size, hidden, latent, c_lnKD, c_sel, kp)

    # two small synthetic junction trees (wid < vocab_size, unique global idx)
    tree0 = build_tree([3, 7, 1, 5, 2], [(0, 1), (1, 2), (1, 3), (0, 4)], 0)
    tree1 = build_tree([4, 9, 6], [(0, 1), (0, 2)], 100)

    x_tree_vecs = jax.random.normal(
        kv, (2, latent + c_lnKD + c_sel), jnp.float32)

    pred_loss, stop_loss, pred_acc, stop_acc = dec.forward(
        [tree0, tree1], x_tree_vecs, mode='avg_loss')
    jax.block_until_ready((pred_loss, stop_loss, pred_acc, stop_acc))
    print("KERNEL_OK")
</pallas_src>

<mosaic_0001>
module attributes {stable_mosaic.version = 11 : i64} {
  func.func @_gru_steps_kernel(%arg0: i32, %arg1: memref<1x8x128xf32, #tpu.memory_space<vmem>>, %arg2: memref<1x128x1xi32, #tpu.memory_space<vmem>>, %arg3: memref<1x128x1xi32, #tpu.memory_space<vmem>>, %arg4: memref<1x1x8xi32, #tpu.memory_space<vmem>>, %arg5: memref<128x128xf32, #tpu.memory_space<vmem>>, %arg6: memref<128x128xf32, #tpu.memory_space<vmem>>, %arg7: memref<1x128xf32, #tpu.memory_space<vmem>>, %arg8: memref<128x128xf32, #tpu.memory_space<vmem>>, %arg9: memref<1x128xf32, #tpu.memory_space<vmem>>, %arg10: memref<128x128xf32, #tpu.memory_space<vmem>>, %arg11: memref<128x128xf32, #tpu.memory_space<vmem>>, %arg12: memref<128x128xf32, #tpu.memory_space<vmem>>, %arg13: memref<1x128xf32, #tpu.memory_space<vmem>>, %arg14: memref<1x8x128xf32, #tpu.memory_space<vmem>>, %arg15: memref<1x8x128xf32, #tpu.memory_space<vmem>>, %arg16: memref<16x128xf32, #tpu.memory_space<vmem>>) attributes {dimension_semantics = [#tpu.dimension_semantics<arbitrary>], iteration_bounds = array<i64: 8>, scalar_prefetch = 0 : i64, scratch_operands = 0 : i64, tpu.core_type = #tpu.core_type<tc>, window_params = [{transform_indices = @transform_0, window_bounds = array<i64: 1, 8, 128>}, {transform_indices = @transform_1, window_bounds = array<i64: 1, 128, 1>}, {transform_indices = @transform_2, window_bounds = array<i64: 1, 128, 1>}, {transform_indices = @transform_3, window_bounds = array<i64: 1, 1, 8>}, {pipeline_mode = #tpu.pipeline_mode<synchronous>, transform_indices = @transform_4, window_bounds = array<i64: 128, 128>}, {pipeline_mode = #tpu.pipeline_mode<synchronous>, transform_indices = @transform_5, window_bounds = array<i64: 128, 128>}, {pipeline_mode = #tpu.pipeline_mode<synchronous>, transform_indices = @transform_6, window_bounds = array<i64: 1, 128>}, {pipeline_mode = #tpu.pipeline_mode<synchronous>, transform_indices = @transform_7, window_bounds = array<i64: 128, 128>}, {pipeline_mode = #tpu.pipeline_mode<synchronous>, transform_indices = @transform_8, window_bounds = array<i64: 1, 128>}, {pipeline_mode = #tpu.pipeline_mode<synchronous>, transform_indices = @transform_9, window_bounds = array<i64: 128, 128>}, {pipeline_mode = #tpu.pipeline_mode<synchronous>, transform_indices = @transform_10, window_bounds = array<i64: 128, 128>}, {pipeline_mode = #tpu.pipeline_mode<synchronous>, transform_indices = @transform_11, window_bounds = array<i64: 128, 128>}, {pipeline_mode = #tpu.pipeline_mode<synchronous>, transform_indices = @transform_12, window_bounds = array<i64: 1, 128>}, {transform_indices = @transform_13, window_bounds = array<i64: 1, 8, 128>}, {transform_indices = @transform_14, window_bounds = array<i64: 1, 8, 128>}, {pipeline_mode = #tpu.pipeline_mode<synchronous>, transform_indices = @transform_15, window_bounds = array<i64: 16, 128>}]} {
    %c0_i32 = arith.constant 0 : i32
    %0 = arith.cmpi eq, %arg0, %c0_i32 : i32
    %1 = arith.extui %0 : i1 to i32
    %c0_i32_0 = arith.constant 0 : i32
    %2 = arith.cmpi ne, %1, %c0_i32_0 : i32
    scf.if %2 {
      %cst_59 = arith.constant 0.000000e+00 : f32
      %108 = vector.broadcast %cst_59 : f32 to vector<16x128xf32>
      %c0_60 = arith.constant 0 : index
      %c0_61 = arith.constant 0 : index
      %109 = vector.load %arg16[%c0_60, %c0_61] : memref<16x128xf32, #tpu.memory_space<vmem>>, vector<16x128xf32>
      tpu.vector_store %arg16[%c0_60, %c0_61], %108 {strides = array<i32>} : memref<16x128xf32, #tpu.memory_space<vmem>>, vector<16x128xf32>,
    } else {
    }
    %c0 = arith.constant 0 : index
    %c0_1 = arith.constant 0 : index
    %c0_2 = arith.constant 0 : index
    %3 = vector.load %arg1[%c0, %c0_1, %c0_2] : memref<1x8x128xf32, #tpu.memory_space<vmem>>, vector<1x8x128xf32>
    %4 = vector.shape_cast %3 : vector<1x8x128xf32> to vector<8x128xf32>
    %c0_3 = arith.constant 0 : index
    %c0_4 = arith.constant 0 : index
    %c0_5 = arith.constant 0 : index
    %5 = vector.load %arg2[%c0_3, %c0_4, %c0_5] : memref<1x128x1xi32, #tpu.memory_space<vmem>>, vector<1x128x1xi32>
    %6 = vector.shape_cast %5 : vector<1x128x1xi32> to vector<128x1xi32>
    %c0_6 = arith.constant 0 : index
    %c0_7 = arith.constant 0 : index
    %c0_8 = arith.constant 0 : index
    %7 = vector.load %arg3[%c0_6, %c0_7, %c0_8] : memref<1x128x1xi32, #tpu.memory_space<vmem>>, vector<1x128x1xi32>
    %8 = vector.shape_cast %7 : vector<1x128x1xi32> to vector<128x1xi32>
    %c0_9 = arith.constant 0 : index
    %c0_10 = arith.constant 0 : index
    %c0_11 = arith.constant 0 : index
    %9 = vector.load %arg4[%c0_9, %c0_10, %c0_11] : memref<1x1x8xi32, #tpu.memory_space<vmem>>, vector<1x1x8xi32>
    %10 = vector.shape_cast %9 : vector<1x1x8xi32> to vector<1x8xi32>
    %c0_12 = arith.constant 0 : index
    %c0_13 = arith.constant 0 : index
    %11 = vector.load %arg16[%c0_12, %c0_13] : memref<16x128xf32, #tpu.memory_space<vmem>>, vector<16x128xf32>
    %12 = tpu.iota {dimensions = array<i32: 1>} : vector<128x16xi32>
    %13 = vector.broadcast %6 : vector<128x1xi32> to vector<128x16xi32>
    %14 = arith.cmpi eq, %12, %13 : vector<128x16xi32>
    %15 = arith.extui %14 : vector<128x16xi1> to vector<128x16xi32>
    %16 = arith.sitofp %15 : vector<128x16xi32> to vector<128x16xf32>
    %17 = vector.broadcast %8 : vector<128x1xi32> to vector<128x16xi32>
    %18 = arith.cmpi eq, %12, %17 : vector<128x16xi32>
    %19 = arith.extui %18 : vector<128x16xi1> to vector<128x16xi32>
    %20 = arith.sitofp %19 : vector<128x16xi32> to vector<128x16xf32>
    %cst = arith.constant dense<0.000000e+00> : vector<128x128xf32>
    %21 = tpu.matmul %16, %11, %cst {dimension_numbers = #tpu.dot_dimension_numbers<[1], [0], [0], [1], [0, 0, 1, 1], [], []>} : vector<128x16xf32>, vector<16x128xf32>, vector<128x128xf32> -> vector<128x128xf32>
    %cst_14 = arith.constant dense<0.000000e+00> : vector<128x128xf32>
    %22 = tpu.matmul %20, %11, %cst_14 {dimension_numbers = #tpu.dot_dimension_numbers<[1], [0], [0], [1], [0, 0, 1, 1], [], []>} : vector<128x16xf32>, vector<16x128xf32>, vector<128x128xf32> -> vector<128x128xf32>
    %23 = tpu.iota {dimensions = array<i32: 0>} : vector<8x128xi32>
    %24 = tpu.iota {dimensions = array<i32: 1>} : vector<8x128xi32>
    %c16_i32 = arith.constant 16 : i32
    %25 = vector.broadcast %c16_i32 : i32 to vector<8x128xi32>
    %26 = arith.muli %23, %25 : vector<8x128xi32>
    %27 = arith.cmpi sge, %24, %26 : vector<8x128xi32>
    %c1_i32 = arith.constant 1 : i32
    %28 = vector.broadcast %c1_i32 : i32 to vector<8x128xi32>
    %29 = arith.addi %23, %28 : vector<8x128xi32>
    %c16_i32_15 = arith.constant 16 : i32
    %30 = vector.broadcast %c16_i32_15 : i32 to vector<8x128xi32>
    %31 = arith.muli %29, %30 : vector<8x128xi32>
    %32 = arith.cmpi slt, %24, %31 : vector<8x128xi32>
    %33 = arith.andi %27, %32 : vector<8x128xi1>
    %34 = arith.extui %33 : vector<8x128xi1> to vector<8x128xi32>
    %35 = arith.sitofp %34 : vector<8x128xi32> to vector<8x128xf32>
    %36 = tpu.iota {dimensions = array<i32: 0>} : vector<128x8xi32>
    %37 = tpu.iota {dimensions = array<i32: 1>} : vector<128x8xi32>
    %c16_i32_16 = arith.constant 16 : i32
    %38 = vector.broadcast %c16_i32_16 : i32 to vector<128x8xi32>
    %39 = arith.muli %37, %38 : vector<128x8xi32>
    %40 = arith.cmpi sge, %36, %39 : vector<128x8xi32>
    %c1_i32_17 = arith.constant 1 : i32
    %41 = vector.broadcast %c1_i32_17 : i32 to vector<128x8xi32>
    %42 = arith.addi %37, %41 : vector<128x8xi32>
    %c16_i32_18 = arith.constant 16 : i32
    %43 = vector.broadcast %c16_i32_18 : i32 to vector<128x8xi32>
    %44 = arith.muli %42, %43 : vector<128x8xi32>
    %45 = arith.cmpi slt, %36, %44 : vector<128x8xi32>
    %46 = arith.andi %40, %45 : vector<128x8xi1>
    %47 = arith.extui %46 : vector<128x8xi1> to vector<128x8xi32>
    %48 = arith.sitofp %47 : vector<128x8xi32> to vector<128x8xf32>
    %cst_19 = arith.constant dense<0.000000e+00> : vector<8x128xf32>
    %49 = tpu.matmul %35, %21, %cst_19 {dimension_numbers = #tpu.dot_dimension_numbers<[1], [0], [0], [1], [0, 0, 1, 1], [], []>} : vector<8x128xf32>, vector<128x128xf32>, vector<8x128xf32> -> vector<8x128xf32>
    %cst_20 = arith.constant dense<0.000000e+00> : vector<8x128xf32>
    %50 = tpu.matmul %35, %22, %cst_20 {dimension_numbers = #tpu.dot_dimension_numbers<[1], [0], [0], [1], [0, 0, 1, 1], [], []>} : vector<8x128xf32>, vector<128x128xf32>, vector<8x128xf32> -> vector<8x128xf32>
    %c0_21 = arith.constant 0 : index
    %c0_22 = arith.constant 0 : index
    %51 = vector.load %arg5[%c0_21, %c0_22] : memref<128x128xf32, #tpu.memory_space<vmem>>, vector<128x128xf32>
    %cst_23 = arith.constant dense<0.000000e+00> : vector<8x128xf32>
    %52 = tpu.matmul %4, %51, %cst_23 {dimension_numbers = #tpu.dot_dimension_numbers<[1], [0], [0], [1], [0, 0, 1, 1], [], []>} : vector<8x128xf32>, vector<128x128xf32>, vector<8x128xf32> -> vector<8x128xf32>
    %c0_24 = arith.constant 0 : index
    %c0_25 = arith.constant 0 : index
    %53 = vector.load %arg6[%c0_24, %c0_25] : memref<128x128xf32, #tpu.memory_space<vmem>>, vector<128x128xf32>
    %cst_26 = arith.constant dense<0.000000e+00> : vector<8x128xf32>
    %54 = tpu.matmul %49, %53, %cst_26 {dimension_numbers = #tpu.dot_dimension_numbers<[1], [0], [0], [1], [0, 0, 1, 1], [], []>} : vector<8x128xf32>, vector<128x128xf32>, vector<8x128xf32> -> vector<8x128xf32>
    %55 = arith.addf %52, %54 : vector<8x128xf32>
    %c0_27 = arith.constant 0 : index
    %c0_28 = arith.constant 0 : index
    %56 = vector.load %arg7[%c0_27, %c0_28] : memref<1x128xf32, #tpu.memory_space<vmem>>, vector<1x128xf32>
    %57 = vector.broadcast %56 : vector<1x128xf32> to vector<8x128xf32>
    %58 = arith.addf %55, %57 : vector<8x128xf32>
    %59 = arith.negf %58 : vector<8x128xf32>
    %60 = math.exp %59 : vector<8x128xf32>
    %cst_29 = arith.constant 1.000000e+00 : f32
    %61 = vector.broadcast %cst_29 : f32 to vector<8x128xf32>
    %62 = arith.addf %61, %60 : vector<8x128xf32>
    %63 = arith.divf %61, %62 : vector<8x128xf32>
    %c0_30 = arith.constant 0 : index
    %c0_31 = arith.constant 0 : index
    %64 = vector.load %arg8[%c0_30, %c0_31] : memref<128x128xf32, #tpu.memory_space<vmem>>, vector<128x128xf32>
    %cst_32 = arith.constant dense<0.000000e+00> : vector<8x128xf32>
    %65 = tpu.matmul %4, %64, %cst_32 {dimension_numbers = #tpu.dot_dimension_numbers<[1], [0], [0], [1], [0, 0, 1, 1], [], []>} : vector<8x128xf32>, vector<128x128xf32>, vector<8x128xf32> -> vector<8x128xf32>
    %c0_33 = arith.constant 0 : index
    %c0_34 = arith.constant 0 : index
    %66 = vector.load %arg9[%c0_33, %c0_34] : memref<1x128xf32, #tpu.memory_space<vmem>>, vector<1x128xf32>
    %67 = vector.broadcast %66 : vector<1x128xf32> to vector<8x128xf32>
    %68 = arith.addf %65, %67 : vector<8x128xf32>
    %c0_35 = arith.constant 0 : index
    %c0_36 = arith.constant 0 : index
    %69 = vector.load %arg10[%c0_35, %c0_36] : memref<128x128xf32, #tpu.memory_space<vmem>>, vector<128x128xf32>
    %cst_37 = arith.constant dense<0.000000e+00> : vector<128x128xf32>
    %70 = tpu.matmul %21, %69, %cst_37 {dimension_numbers = #tpu.dot_dimension_numbers<[1], [0], [0], [1], [0, 0, 1, 1], [], []>} : vector<128x128xf32>, vector<128x128xf32>, vector<128x128xf32> -> vector<128x128xf32>
    %cst_38 = arith.constant dense<0.000000e+00> : vector<128x128xf32>
    %71 = tpu.matmul %48, %68, %cst_38 {dimension_numbers = #tpu.dot_dimension_numbers<[1], [0], [0], [1], [0, 0, 1, 1], [], []>} : vector<128x8xf32>, vector<8x128xf32>, vector<128x128xf32> -> vector<128x128xf32>
    %72 = arith.addf %71, %70 : vector<128x128xf32>
    %73 = arith.negf %72 : vector<128x128xf32>
    %74 = math.exp %73 : vector<128x128xf32>
    %cst_39 = arith.constant 1.000000e+00 : f32
    %75 = vector.broadcast %cst_39 : f32 to vector<128x128xf32>
    %76 = arith.addf %75, %74 : vector<128x128xf32>
    %77 = arith.divf %75, %76 : vector<128x128xf32>
    %78 = arith.mulf %77, %21 : vector<128x128xf32>
    %cst_40 = arith.constant dense<0.000000e+00> : vector<8x128xf32>
    %79 = tpu.matmul %35, %78, %cst_40 {dimension_numbers = #tpu.dot_dimension_numbers<[1], [0], [0], [1], [0, 0, 1, 1], [], []>} : vector<8x128xf32>, vector<128x128xf32>, vector<8x128xf32> -> vector<8x128xf32>
    %c0_41 = arith.constant 0 : index
    %c0_42 = arith.constant 0 : index
    %80 = vector.load %arg11[%c0_41, %c0_42] : memref<128x128xf32, #tpu.memory_space<vmem>>, vector<128x128xf32>
    %cst_43 = arith.constant dense<0.000000e+00> : vector<8x128xf32>
    %81 = tpu.matmul %4, %80, %cst_43 {dimension_numbers = #tpu.dot_dimension_numbers<[1], [0], [0], [1], [0, 0, 1, 1], [], []>} : vector<8x128xf32>, vector<128x128xf32>, vector<8x128xf32> -> vector<8x128xf32>
    %c0_44 = arith.constant 0 : index
    %c0_45 = arith.constant 0 : index
    %82 = vector.load %arg12[%c0_44, %c0_45] : memref<128x128xf32, #tpu.memory_space<vmem>>, vector<128x128xf32>
    %cst_46 = arith.constant dense<0.000000e+00> : vector<8x128xf32>
    %83 = tpu.matmul %79, %82, %cst_46 {dimension_numbers = #tpu.dot_dimension_numbers<[1], [0], [0], [1], [0, 0, 1, 1], [], []>} : vector<8x128xf32>, vector<128x128xf32>, vector<8x128xf32> -> vector<8x128xf32>
    %84 = arith.addf %81, %83 : vector<8x128xf32>
    %c0_47 = arith.constant 0 : index
    %c0_48 = arith.constant 0 : index
    %85 = vector.load %arg13[%c0_47, %c0_48] : memref<1x128xf32, #tpu.memory_space<vmem>>, vector<1x128xf32>
    %86 = vector.broadcast %85 : vector<1x128xf32> to vector<8x128xf32>
    %87 = arith.addf %84, %86 : vector<8x128xf32>
    %88 = math.tanh %87 : vector<8x128xf32>
    %cst_49 = arith.constant 1.000000e+00 : f32
    %89 = vector.broadcast %cst_49 : f32 to vector<8x128xf32>
    %90 = arith.subf %89, %63 : vector<8x128xf32>
    %91 = arith.mulf %90, %49 : vector<8x128xf32>
    %92 = arith.mulf %63, %88 : vector<8x128xf32>
    %93 = arith.addf %91, %92 : vector<8x128xf32>
    %c0_50 = arith.constant 0 : index
    %c0_51 = arith.constant 0 : index
    %c0_52 = arith.constant 0 : index
    %94 = vector.load %arg14[%c0_50, %c0_51, %c0_52] : memref<1x8x128xf32, #tpu.memory_space<vmem>>, vector<1x8x128xf32>
    %95 = vector.shape_cast %94 : vector<1x8x128xf32> to vector<8x128xf32>
    %96 = vector.shape_cast %93 : vector<8x128xf32> to vector<1x8x128xf32>
    tpu.vector_store %arg14[%c0_50, %c0_51, %c0_52], %96 {strides = array<i32>} : memref<1x8x128xf32, #tpu.memory_space<vmem>>, vector<1x8x128xf32>,
    %c0_53 = arith.constant 0 : index
    %c0_54 = arith.constant 0 : index
    %c0_55 = arith.constant 0 : index
    %97 = vector.load %arg15[%c0_53, %c0_54, %c0_55] : memref<1x8x128xf32, #tpu.memory_space<vmem>>, vector<1x8x128xf32>
    %98 = vector.shape_cast %97 : vector<1x8x128xf32> to vector<8x128xf32>
    %99 = vector.shape_cast %50 : vector<8x128xf32> to vector<1x8x128xf32>
    tpu.vector_store %arg15[%c0_53, %c0_54, %c0_55], %99 {strides = array<i32>} : memref<1x8x128xf32, #tpu.memory_space<vmem>>, vector<1x8x128xf32>,
    %100 = tpu.iota {dimensions = array<i32: 0>} : vector<16x8xi32>
    %101 = vector.broadcast %10 : vector<1x8xi32> to vector<16x8xi32>
    %102 = arith.cmpi eq, %100, %101 : vector<16x8xi32>
    %103 = arith.extui %102 : vector<16x8xi1> to vector<16x8xi32>
    %104 = arith.sitofp %103 : vector<16x8xi32> to vector<16x8xf32>
    %cst_56 = arith.constant dense<0.000000e+00> : vector<16x128xf32>
    %105 = tpu.matmul %104, %93, %cst_56 {dimension_numbers = #tpu.dot_dimension_numbers<[1], [0], [0], [1], [0, 0, 1, 1], [], []>} : vector<16x8xf32>, vector<8x128xf32>, vector<16x128xf32> -> vector<16x128xf32>
    %106 = arith.addf %11, %105 : vector<16x128xf32>
    %c0_57 = arith.constant 0 : index
    %c0_58 = arith.constant 0 : index
    %107 = vector.load %arg16[%c0_57, %c0_58] : memref<16x128xf32, #tpu.memory_space<vmem>>, vector<16x128xf32>
    tpu.vector_store %arg16[%c0_57, %c0_58], %106 {strides = array<i32>} : memref<16x128xf32, #tpu.memory_space<vmem>>, vector<16x128xf32>,
    return
  }
  func.func @transform_0(%arg0: i32) -> (i32, i32, i32) {
    %c0_i32 = arith.constant 0 : i32
    %c0_i32_0 = arith.constant 0 : i32
    %c0_i32_1 = arith.constant 0 : i32
    return %arg0, %c0_i32, %c0_i32_0 : i32, i32, i32
  }
  func.func @transform_1(%arg0: i32) -> (i32, i32, i32) {
    %c0_i32 = arith.constant 0 : i32
    %c0_i32_0 = arith.constant 0 : i32
    %c0_i32_1 = arith.constant 0 : i32
    return %arg0, %c0_i32, %c0_i32_0 : i32, i32, i32
  }
  func.func @transform_2(%arg0: i32) -> (i32, i32, i32) {
    %c0_i32 = arith.constant 0 : i32
    %c0_i32_0 = arith.constant 0 : i32
    %c0_i32_1 = arith.constant 0 : i32
    return %arg0, %c0_i32, %c0_i32_0 : i32, i32, i32
  }
  func.func @transform_3(%arg0: i32) -> (i32, i32, i32) {
    %c0_i32 = arith.constant 0 : i32
    %c0_i32_0 = arith.constant 0 : i32
    %c0_i32_1 = arith.constant 0 : i32
    return %arg0, %c0_i32, %c0_i32_0 : i32, i32, i32
  }
  func.func @transform_4(%arg0: i32) -> (i32, i32) {
    %c0_i32 = arith.constant 0 : i32
    %c0_i32_0 = arith.constant 0 : i32
    %c0_i32_1 = arith.constant 0 : i32
    return %c0_i32, %c0_i32_0 : i32, i32
  }
  func.func @transform_5(%arg0: i32) -> (i32, i32) {
    %c0_i32 = arith.constant 0 : i32
    %c0_i32_0 = arith.constant 0 : i32
    %c0_i32_1 = arith.constant 0 : i32
    return %c0_i32, %c0_i32_0 : i32, i32
  }
  func.func @transform_6(%arg0: i32) -> (i32, i32) {
    %c0_i32 = arith.constant 0 : i32
    %c0_i32_0 = arith.constant 0 : i32
    %c0_i32_1 = arith.constant 0 : i32
    return %c0_i32, %c0_i32_0 : i32, i32
  }
  func.func @transform_7(%arg0: i32) -> (i32, i32) {
    %c0_i32 = arith.constant 0 : i32
    %c0_i32_0 = arith.constant 0 : i32
    %c0_i32_1 = arith.constant 0 : i32
    return %c0_i32, %c0_i32_0 : i32, i32
  }
  func.func @transform_8(%arg0: i32) -> (i32, i32) {
    %c0_i32 = arith.constant 0 : i32
    %c0_i32_0 = arith.constant 0 : i32
    %c0_i32_1 = arith.constant 0 : i32
    return %c0_i32, %c0_i32_0 : i32, i32
  }
  func.func @transform_9(%arg0: i32) -> (i32, i32) {
    %c0_i32 = arith.constant 0 : i32
    %c0_i32_0 = arith.constant 0 : i32
    %c0_i32_1 = arith.constant 0 : i32
    return %c0_i32, %c0_i32_0 : i32, i32
  }
  func.func @transform_10(%arg0: i32) -> (i32, i32) {
    %c0_i32 = arith.constant 0 : i32
    %c0_i32_0 = arith.constant 0 : i32
    %c0_i32_1 = arith.constant 0 : i32
    return %c0_i32, %c0_i32_0 : i32, i32
  }
  func.func @transform_11(%arg0: i32) -> (i32, i32) {
    %c0_i32 = arith.constant 0 : i32
    %c0_i32_0 = arith.constant 0 : i32
    %c0_i32_1 = arith.constant 0 : i32
    return %c0_i32, %c0_i32_0 : i32, i32
  }
  func.func @transform_12(%arg0: i32) -> (i32, i32) {
    %c0_i32 = arith.constant 0 : i32
    %c0_i32_0 = arith.constant 0 : i32
    %c0_i32_1 = arith.constant 0 : i32
    return %c0_i32, %c0_i32_0 : i32, i32
  }
  func.func @transform_13(%arg0: i32) -> (i32, i32, i32) {
    %c0_i32 = arith.constant 0 : i32
    %c0_i32_0 = arith.constant 0 : i32
    %c0_i32_1 = arith.constant 0 : i32
    return %arg0, %c0_i32, %c0_i32_0 : i32, i32, i32
  }
  func.func @transform_14(%arg0: i32) -> (i32, i32, i32) {
    %c0_i32 = arith.constant 0 : i32
    %c0_i32_0 = arith.constant 0 : i32
    %c0_i32_1 = arith.constant 0 : i32
    return %arg0, %c0_i32, %c0_i32_0 : i32, i32, i32
  }
  func.func @transform_15(%arg0: i32) -> (i32, i32) {
    %c0_i32 = arith.constant 0 : i32
    %c0_i32_0 = arith.constant 0 : i32
    %c0_i32_1 = arith.constant 0 : i32
    return %c0_i32, %c0_i32_0 : i32, i32
  }
}

</mosaic_0001>

<bundles_post_ra>
// kernel: tpu_custom_call.1
= control target key start
LH: loop header
LB: loop body
LE: loop exit
PB: predicated region body
PF: predicated region fallthrough
CT: control target
= control target key end

     0   :  { %s4934_s0 = inlined_call_operand.vmem [shape: f32[8,8,128], index: 0, kind: input, shape index: {}]   ;;  %s4935_s1 = inlined_call_operand.vmem [shape: s32[8,128,1], index: 1, kind: input, shape index: {}]   ;;  %s4936_s2 = inlined_call_operand.vmem [shape: s32[8,128,1], index: 2, kind: input, shape index: {}]   ;;  %s4937_s3 = inlined_call_operand.vmem [shape: s32[8,1,8], index: 3, kind: input, shape index: {}]   ;;  %s4938_s4 = inlined_call_operand.vmem [shape: f32[128,128], index: 4, kind: input, shape index: {}]   ;;  %s4939_s5 = inlined_call_operand.vmem [shape: f32[128,128], index: 5, kind: input, shape index: {}]   ;;  %s4940_s6 = inlined_call_operand.vmem [shape: f32[1,128], index: 6, kind: input, shape index: {}]   ;;  %s4941_s7 = inlined_call_operand.vmem [shape: f32[128,128], index: 7, kind: input, shape index: {}]   ;;  %s4942_s8 = inlined_call_operand.vmem [shape: f32[1,128], index: 8, kind: input, shape index: {}]   ;;  %s4943_s9 = inlined_call_operand.vmem [shape: f32[128,128], index: 9, kind: input, shape index: {}]   ;;  %s4944_s10 = inlined_call_operand.vmem [shape: f32[128,128], index: 10, kind: input, shape index: {}]   ;;  %s4945_s11 = inlined_call_operand.vmem [shape: f32[128,128], index: 11, kind: input, shape index: {}]   ;;  %s4946_s12 = inlined_call_operand.vmem [shape: f32[1,128], index: 12, kind: input, shape index: {}]   ;;  %s4947_s13 = inlined_call_operand.hbm [shape: f32[8,8,128], index: 13, kind: output, shape index: {0}]   ;;  %s4948_s14 = inlined_call_operand.hbm [shape: f32[8,8,128], index: 14, kind: output, shape index: {1}]   ;;  %s4949_s15 = inlined_call_operand.hbm [shape: f32[16,128], index: 15, kind: output, shape index: {2}]  }
   0x1   :  { %4974 = sst [smem:[#allocation21_spill]] %s4934_s0 }
   0x2   :  { %4975 = sst [smem:[#allocation22_spill]] %s4946_s12 }
   0x3   :  { %4976 = sst [smem:[#allocation23_spill]] %s4947_s13 }
   0x4   :  { %4977 = sst [smem:[#allocation24_spill]] %s4948_s14 }
   0x5   :  { %4978 = sst [smem:[#allocation25_spill]] %s4949_s15 }
   0x6   :  { %21 = vsyncpa [#allocation3], 0 }
   0x7   :  { %23 = vsyncpa [#allocation3 + $0x1], 0 }
   0x8   :  { %24 = vsyncpa [#allocation5], 0 }
   0x9   :  { %26 = vsyncpa [#allocation5 + $0x1], 0  ;;  %s3837_s18 = smov 0   ;;  %s3839_s19 = smov 0  }
   0xa   :  { %s3841_s20 = smov 0   ;;  %s3843_s21 = smov 0  }
   0xb LB: > { %4979 = sst [smem:[#allocation10_spill]] %s3733_s18  ;;  %s3858_s22 = sadd.s32 4294967295, %s3745_s21   ;;  %s3745_s21 = sphi %s3843_s21, %s5066_s21   ;;  %s3741_s20 = sphi %s3841_s20, %s5069_s20   ;;  %s3737_s19 = sphi %s3839_s19, %s5068_s19   ;;  %s3733_s18 = sphi %s3837_s18, %s5067_s18  }
   0xc   : > { %4980 = sst [smem:[#allocation11_spill]] %s3737_s19  ;;  %s4950_s23 = sadd.s32 4294967294, %s3745_s21  }
   0xd   : > { %4981 = sst [smem:[#allocation12_spill]] %s3741_s20  ;;  %s3862_s24 = sadd.s32 1, %s3745_s21  }
   0xe   : > { %4982 = sst [smem:[#allocation13_spill]] %s3745_s21  ;;  %s332_s25 = sadd.s32 1, %s3741_s20 }
   0xf   : > { %4983 = sst [smem:[#allocation14_spill]] %s3862_s24  ;;  %s329_s26 = ssub.s32 %s3745_s21, %s3862_s24 }
  0x10   : > { %p342_p0 = scmp.ne.s32.totalorder %s3741_s20, %s3737_s19  ;;  %p330_p1 = scmp.eq.s32.totalorder %s329_s26, 0 }
  0x11   : > { %p343_p2 = scmp.eq.s32.totalorder %s3858_s22, 7  ;;  %p348_p3 = scmp.ne.s32.totalorder %s3737_s19, %s3733_s18 }
  0x12   : > { %p349_p4 = scmp.eq.s32.totalorder %s4950_s23, 7  ;;  %p2703_p7 = scmp.ge.s32.totalorder %s3745_s21, 1 }
  0x13   : > { %s3875_s27 = scalar_select %p330_p1, %s3741_s20, %s332_s25  }
  0x14   : > { %p3879_p5 = por %p343_p2, %p342_p0  ;;  %p3883_p6 = por %p349_p4, %p348_p3 }
  0x15   : > { %4984 = sst [smem:[#allocation15_spill]] %s3875_s27  ;;  %p470_p8 = scmp.lt.s32.totalorder %s3745_s21, 9 }
  0x16   : > { %s4985_s28 = scalar_select %p3879_p5, 1, 0 }
  0x17   : > { %s4987_s29 = scalar_select %p3883_p6, 1, 0 }
  0x18   : > { %4986 = sst [smem:[#allocation16_spill]] %s4985_s28  ;;  %p471_p9 = pnand %p2703_p7, %p470_p8 }
  0x19   : > { %4988 = sst [smem:[#allocation17_spill]] %s4987_s29 }
  0x1a   : > { %474 = sbr.rel (%p471_p9) target bundleno = 1759 (0x6df), region = 72 }
  0x1f   : > { %s4956_s30 = sand.u32 1, %s3737_s19   ;;  %p535_p10 = scmp.lt.s32.totalorder %s3858_s22, 7 }
  0x20   : > { %s3893_s16 = sshll.u32 %s4956_s30, 3  ;;  %s4989_s0 = sld [smem:[#allocation21_spill]] }
  0x21   : > { %s3896_s17 = scalar_select %p535_p10, %s3858_s22, 7 }
  0x22   : > { %s4973_s28 = scalar_lea.vmem [#allocation2], %s3893_s16  ;;  %s532_s12 = scalar_lea.vmem [#allocation4], %s3893_s16 }
  0x23   : > { %s2706_s25 = sshll.u32 %s3896_s17, 3  ;;  %s2845_s26 = sshll.u32 %s3896_s17, 7 }
  0x24   : > { %s3908_s18 = scalar_lea.vmem %s4935_s1, %s2845_s26  ;;  %s3913_s15 = scalar_lea.vmem %s4936_s2, %s2845_s26 }
  0x25   : > { %s551_s14 = scalar_lea.vmem %s4937_s3, %s3896_s17  ;;  %p2711_p11 = scmp.ne.s32.totalorder %s3858_s22, 0 }
  0x26   : > { %s3903_s20 = scalar_lea.vmem %s4989_s0, %s2706_s25 }
  0x27   : > { %555 = sbr.rel (%p2711_p11) target bundleno = 46 (0x2e), region = 76 }
  0x2c   : > { %v3747_v0 = vmov 0.0  }
  0x2d   : > { %556 = vst [vmem:[#allocation6] sm:$0xff] %v3747_v0  ;;  %557 = vst [vmem:[#allocation6 + $0x8] sm:$0xff] %v3747_v0 }
  0x2e PF: > { %v561_v1 = vld [vmem:[%s3908_s18 + $0x10] sm:$0xff]  ;;  %v559_v2 = vld [vmem:[%s3908_s18] sm:$0xff]  ;;  %v3748_v3 = vmov 0   ;;  %v562_v4 = vld [vmem:[%s3908_s18 + $0x18] sm:$0xff]  ;;  %v4969_v14 = vmov 0.0   ;;  %v594_v37 = vlaneseq  ;;  %vm788_vm0 = vcmask 130048  }
  0x2f   : > { %3553 = vset.pattern.permute.xlu1 %v3748_v3  ;;  %3552 = vset.pattern.permute.xlu0 %v3748_v3  ;;  %v560_v5 = vld [vmem:[%s3908_s18 + $0x8] sm:$0xff]  ;;  %v563_v7 = vld [vmem:[%s3908_s18 + $0x20] sm:$0xff]  ;;  %v566_v9 = vld [vmem:[%s3908_s18 + $0x38] sm:$0xff]  ;;  %s5050_s23 = sld [smem:[#allocation22_spill]]  ;;  %s2526_s27 = sand.u32 1, %s3858_s22  }
  0x30   : > { %603 = vperm.xlu1 %3553, %v561_v1   ;;  %597 = vperm.xlu0 %3552, %v559_v2   ;;  %v564_v6 = vld [vmem:[%s3908_s18 + $0x28] sm:$0xff]  ;;  %v565_v10 = vld [vmem:[%s3908_s18 + $0x30] sm:$0xff]  ;;  %v567_v13 = vld [vmem:[%s3908_s18 + $0x40] sm:$0xff]  ;;  %v3957_v38 = vand.u32 127, %v594_v37  ;;  %s2839_s29 = sshll.u32 %s3858_s22, 7  ;;  %s5055_s26 = sld [smem:[#allocation24_spill]] }
  0x31   : > { %v568_v12 = vld [vmem:[%s3908_s18 + $0x48] sm:$0xff]  ;;  %v570_v15 = vld [vmem:[%s3908_s18 + $0x58] sm:$0xff]  ;;  %v569_v16 = vld [vmem:[%s3908_s18 + $0x50] sm:$0xff]  ;;  %s2527_s17 = scalar_lea.sflag [#allocation5], %s2526_s27 }
  0x32   : > { %v572_v17 = vld [vmem:[%s3908_s18 + $0x68] sm:$0xff]  ;;  %v571_v18 = vld [vmem:[%s3908_s18 + $0x60] sm:$0xff]  ;;  %v574_v19 = vld [vmem:[%s3908_s18 + $0x78] sm:$0xff] }
  0x33   : > { %v573_v20 = vld [vmem:[%s3908_s18 + $0x70] sm:$0xff]  ;;  %v576_v21 = vld [vmem:[%s3913_s15 + $0x8] sm:$0xff]  ;;  %v575_v22 = vld [vmem:[%s3913_s15] sm:$0xff] }
  0x34   : > { %606 = vperm.xlu1 %3553, %v562_v4   ;;  %600 = vperm.xlu0 %3552, %v560_v5   ;;  %v593_v8 = vld [vmem:[#allocation6 + $0x8] sm:$0xff]  ;;  %v592_v11 = vld [vmem:[#allocation6] sm:$0xff]  ;;  %v578_v23 = vld [vmem:[%s3913_s15 + $0x18] sm:$0xff] }
  0x35   : > { %3071 = vmatprep.subr.mxu0 %v593_v8  ;;  %3099 = vmatprep.subr.mxu1 %v593_v8  ;;  %v577_v24 = vld [vmem:[%s3913_s15 + $0x10] sm:$0xff]  ;;  %v580_v25 = vld [vmem:[%s3913_s15 + $0x28] sm:$0xff]  ;;  %v579_v26 = vld [vmem:[%s3913_s15 + $0x20] sm:$0xff] }
  0x36   : > { %3072 = vmatpush3.msra.mxu0 %v593_v8  ;;  %3100 = vmatpush3.msra.mxu1 %v593_v8  ;;  %v582_v27 = vld [vmem:[%s3913_s15 + $0x38] sm:$0xff]  ;;  %v581_v28 = vld [vmem:[%s3913_s15 + $0x30] sm:$0xff]  ;;  %v584_v29 = vld [vmem:[%s3913_s15 + $0x48] sm:$0xff]  ;;  %s4859_s13 = scalar_lea.hbm %s5055_s26, %s2839_s29 }
  0x37   : > { %3073 = vmatprep.subr.mxu0 %v592_v11  ;;  %3101 = vmatprep.subr.mxu1 %v592_v11  ;;  %v583_v30 = vld [vmem:[%s3913_s15 + $0x40] sm:$0xff]  ;;  %v586_v31 = vld [vmem:[%s3913_s15 + $0x58] sm:$0xff]  ;;  %v585_v32 = vld [vmem:[%s3913_s15 + $0x50] sm:$0xff] }
  0x38   : > { %612 = vperm.xlu1 %3553, %v564_v6   ;;  %609 = vperm.xlu0 %3552, %v563_v7   ;;  %v588_v33 = vld [vmem:[%s3913_s15 + $0x68] sm:$0xff]  ;;  %v587_v34 = vld [vmem:[%s3913_s15 + $0x60] sm:$0xff]  ;;  %v590_v35 = vld [vmem:[%s3913_s15 + $0x78] sm:$0xff] }
  0x39   : > { %3074 = vmatpush3.msra.mxu0 %v592_v11  ;;  %3102 = vmatpush3.msra.mxu1 %v592_v11  ;;  %v589_v36 = vld [vmem:[%s3913_s15 + $0x70] sm:$0xff]  ;;  %s2553_s15 = sshll.u32 %s532_s12, 4  ;;  %s2554_s15 = int_to_ptr.vmem [resolvable:$true] %s2553_s15 }
  0x3a   : > { %3127 = vmatprep.subr.mxu0 %v4969_v14  ;;  %3162 = vmatprep.subr.mxu1 %v4969_v14 }
  0x3c   : > { %618 = vperm.xlu1 %3553, %v566_v9   ;;  %615 = vperm.xlu0 %3552, %v565_v10  }
  0x40   : > { %624 = vperm.xlu1 %3553, %v568_v12   ;;  %621 = vperm.xlu0 %3552, %v567_v13  }
  0x44   : > { %630 = vperm.xlu1 %3553, %v570_v15   ;;  %627 = vperm.xlu0 %3552, %v569_v16  }
  0x48   : > { %636 = vperm.xlu1 %3553, %v572_v17   ;;  %633 = vperm.xlu0 %3552, %v571_v18  }
  0x4c   : > { %642 = vperm.xlu1 %3553, %v574_v19   ;;  %639 = vperm.xlu0 %3552, %v573_v20  }
  0x50   : > { %696 = vperm.xlu1 %3553, %v576_v21   ;;  %693 = vperm.xlu0 %3552, %v575_v22  }
  0x54   : > { %702 = vperm.xlu1 %3553, %v578_v23   ;;  %699 = vperm.xlu0 %3552, %v577_v24  }
  0x58   : > { %708 = vperm.xlu1 %3553, %v580_v25   ;;  %705 = vperm.xlu0 %3552, %v579_v26  }
  0x5c   : > { %714 = vperm.xlu1 %3553, %v582_v27   ;;  %711 = vperm.xlu0 %3552, %v581_v28  }
  0x60   : > { %720 = vperm.xlu1 %3553, %v584_v29   ;;  %717 = vperm.xlu0 %3552, %v583_v30  }
  0x64   : > { %726 = vperm.xlu1 %3553, %v586_v31   ;;  %723 = vperm.xlu0 %3552, %v585_v32  }
  0x68   : > { %732 = vperm.xlu1 %3553, %v588_v33   ;;  %729 = vperm.xlu0 %3552, %v587_v34  }
  0x6c   : > { %738 = vperm.xlu1 %3553, %v590_v35   ;;  %735 = vperm.xlu0 %3552, %v589_v36  }
  0xab   : > { %v604_v39 = vpop.permute.xlu1 %603  ;;  %v598_v40 = vpop.permute.xlu0 %597 }
  0xac   : > { %vm644_vm1 = vcmp.eq.s32.totalorder %v3957_v38, %v598_v40  ;;  %vm646_vm2 = vcmp.eq.s32.totalorder %v3957_v38, %v604_v39 }
  0xad   : > { %v2712_v41 = vsel %vm644_vm1, 1.0, %v4969_v14  ;;  %v2714_v44 = vsel %vm646_vm2, 1.0, %v4969_v14 }
  0xae   : > { %3075 = vmatprep.mubr.msk.f32.mxu0 %vm788_vm0, %v2712_v41 }
  0xaf   : > { %v607_v42 = vpop.permute.xlu1 %606  ;;  %v601_v43 = vpop.permute.xlu0 %600 }
  0xb0   : > { %vm645_vm3 = vcmp.eq.s32.totalorder %v3957_v38, %v601_v43  ;;  %vm647_vm4 = vcmp.eq.s32.totalorder %v3957_v38, %v607_v42 }
  0xb1   : > { %v2713_v45 = vsel %vm645_vm3, 1.0, %v4969_v14  ;;  %v2715_v48 = vsel %vm647_vm4, 1.0, %v4969_v14 }
  0xb2   : > { %3076 = vmatmul.mubr.msk.f32.vlgmr.msra.gmra.mxu0 %vm788_vm0, %v2713_v45 }
  0xb3   : > { %v613_v46 = vpop.permute.xlu1 %612  ;;  %3078 = vmatprep.mubr.msk.f32.mxu0 %vm788_vm0, %v2714_v44  ;;  %v610_v47 = vpop.permute.xlu0 %609 }
  0xb4   : > { %vm648_vm5 = vcmp.eq.s32.totalorder %v3957_v38, %v610_v47  ;;  %vm649_vm6 = vcmp.eq.s32.totalorder %v3957_v38, %v613_v46 }
  0xb5   : > { %v2716_v49 = vsel %vm648_vm5, 1.0, %v4969_v14  ;;  %v2717_v52 = vsel %vm649_vm6, 1.0, %v4969_v14 }
  0xb6   : > { %3079 = vmatmul.mubr.msk.f32.gmra.mxu0 %vm788_vm0, %v2715_v48 }
  0xb7   : > { %v619_v50 = vpop.permute.xlu1 %618  ;;  %3081 = vmatprep.mubr.msk.f32.mxu0 %vm788_vm0, %v2716_v49  ;;  %v616_v51 = vpop.permute.xlu0 %615 }
  0xb8   : > { %vm650_vm7 = vcmp.eq.s32.totalorder %v3957_v38, %v616_v51  ;;  %vm651_vm8 = vcmp.eq.s32.totalorder %v3957_v38, %v619_v50 }
  0xb9   : > { %v2718_v53 = vsel %vm650_vm7, 1.0, %v4969_v14  ;;  %v2719_v56 = vsel %vm651_vm8, 1.0, %v4969_v14 }
  0xba   : > { %3082 = vmatmul.mubr.msk.f32.gmra.mxu0 %vm788_vm0, %v2717_v52 }
  0xbb   : > { %v625_v54 = vpop.permute.xlu1 %624  ;;  %3084 = vmatprep.mubr.msk.f32.mxu0 %vm788_vm0, %v2718_v53  ;;  %v622_v55 = vpop.permute.xlu0 %621 }
  0xbc   : > { %vm652_vm9 = vcmp.eq.s32.totalorder %v3957_v38, %v622_v55  ;;  %vm653_vm10 = vcmp.eq.s32.totalorder %v3957_v38, %v625_v54 }
  0xbd   : > { %v2720_v57 = vsel %vm652_vm9, 1.0, %v4969_v14  ;;  %v2721_v60 = vsel %vm653_vm10, 1.0, %v4969_v14 }
  0xbe   : > { %3085 = vmatmul.mubr.msk.f32.gmra.mxu0 %vm788_vm0, %v2719_v56 }
  0xbf   : > { %v631_v58 = vpop.permute.xlu1 %630  ;;  %3087 = vmatprep.mubr.msk.f32.mxu0 %vm788_vm0, %v2720_v57  ;;  %v628_v59 = vpop.permute.xlu0 %627 }
  0xc0   : > { %vm654_vm11 = vcmp.eq.s32.totalorder %v3957_v38, %v628_v59  ;;  %vm655_vm12 = vcmp.eq.s32.totalorder %v3957_v38, %v631_v58 }
  0xc1   : > { %v2722_v61 = vsel %vm654_vm11, 1.0, %v4969_v14  ;;  %v2723_v0 = vsel %vm655_vm12, 1.0, %v4969_v14 }
  0xc2   : > { %3088 = vmatmul.mubr.msk.f32.gmra.mxu0 %vm788_vm0, %v2721_v60 }
  0xc3   : > { %v637_v62 = vpop.permute.xlu1 %636  ;;  %3090 = vmatprep.mubr.msk.f32.mxu0 %vm788_vm0, %v2722_v61  ;;  %v634_v63 = vpop.permute.xlu0 %633 }
  0xc4   : > { %vm656_vm13 = vcmp.eq.s32.totalorder %v3957_v38, %v634_v63  ;;  %vm657_vm14 = vcmp.eq.s32.totalorder %v3957_v38, %v637_v62 }
  0xc5   : > { %v2724_v1 = vsel %vm656_vm13, 1.0, %v4969_v14  ;;  %v2725_v4 = vsel %vm657_vm14, 1.0, %v4969_v14 }
  0xc6   : > { %3091 = vmatmul.mubr.msk.f32.gmra.mxu0 %vm788_vm0, %v2723_v0 }
  0xc7   : > { %v643_v2 = vpop.permute.xlu1 %642  ;;  %3093 = vmatprep.mubr.msk.f32.mxu0 %vm788_vm0, %v2724_v1  ;;  %v640_v3 = vpop.permute.xlu0 %639  ;;  %v4120_v1 = vshrl.u32 %v594_v37, 7 }
  0xc8   : > { %vm658_vm15 = vcmp.eq.s32.totalorder %v3957_v38, %v640_v3  ;;  %vm659_vm1 = vcmp.eq.s32.totalorder %v3957_v38, %v643_v2 }
  0xc9   : > { %v2726_v5 = vsel %vm658_vm15, 1.0, %v4969_v14  ;;  %v2727_v8 = vsel %vm659_vm1, 1.0, %v4969_v14 }
  0xca   : > { %3094 = vmatmul.mubr.msk.f32.gmra.mxu0 %vm788_vm0, %v2725_v4  ;;  %v1179_v4 = vadd.s32 1, %v4120_v1 }
  0xcb   : > { %v697_v6 = vpop.permute.xlu1 %696  ;;  %3096 = vmatprep.mubr.msk.f32.mxu0 %vm788_vm0, %v2726_v5  ;;  %v694_v7 = vpop.permute.xlu0 %693 }
  0xcc   : > { %vm741_vm2 = vcmp.eq.s32.totalorder %v3957_v38, %v697_v6  ;;  %vm740_vm3 = vcmp.eq.s32.totalorder %v3957_v38, %v694_v7  ;;  %v1177_v6 = vmul.u32 16, %v4120_v1  ;;  %v1180_v7 = vmul.u32 16, %v1179_v4  ;;  %v1717_v4 = vld [vmem:[%s4943_s9 + $0x78] sm:$0xff] }
  0xcd   : > { %v2729_v9 = vsel %vm741_vm2, 1.0, %v4969_v14  ;;  %v2728_v10 = vsel %vm740_vm3, 1.0, %v4969_v14  ;;  %vm4964_vm3 = vmmov 0  }
  0xce   : > { %3097 = vmatmul.mubr.msk.f32.gmra.mxu0 %vm788_vm0, %v2727_v8  ;;  %3103 = vmatprep.mubr.msk.f32.mxu1 %vm788_vm0, %v2728_v10 }
  0xcf   : > { %v703_v11 = vpop.permute.xlu1 %702  ;;  %3104 = vmatmul.mubr.msk.f32.vlgmr.msra.gmra.mxu1 %vm788_vm0, %v2729_v9  ;;  %v700_v12 = vpop.permute.xlu0 %699  ;;  %3159 = vmatprep.mubr.msk.f32.mxu0 %vm4964_vm3, %v4969_v14 }
  0xd0   : > { %vm743_vm4 = vcmp.eq.s32.totalorder %v3957_v38, %v703_v11  ;;  %vm742_vm5 = vcmp.eq.s32.totalorder %v3957_v38, %v700_v12  ;;  %v4990_v12 = vmov 0 }
  0xd1   : > { %v2731_v13 = vsel %vm743_vm4, 1.0, %v4969_v14  ;;  %v2730_v15 = vsel %vm742_vm5, 1.0, %v4969_v14  ;;  %vm1181_vm4 = vcmp.lt.s32.totalorder %v3957_v38, %v1180_v7  ;;  %v1713_v7 = vld [vmem:[%s4943_s9 + $0x58] sm:$0xff] }
  0xd2   : > { %3106 = vmatprep.mubr.msk.f32.mxu1 %vm788_vm0, %v2730_v15  ;;  %v1454_v15 = vld [vmem:[%s4939_s5 + $0x78] sm:$0xff] }
  0xd3   : > { %v709_v16 = vpop.permute.xlu1 %708  ;;  %3107 = vmatmul.mubr.msk.f32.gmra.mxu1 %vm788_vm0, %v2731_v13  ;;  %v706_v17 = vpop.permute.xlu0 %705 }
  0xd4   : > { %vm745_vm6 = vcmp.eq.s32.totalorder %v3957_v38, %v709_v16  ;;  %vm744_vm7 = vcmp.eq.s32.totalorder %v3957_v38, %v706_v17  ;;  %v4968_v16 = vmov 1.0   ;;  %v1453_v17 = vld [vmem:[%s4939_s5 + $0x70] sm:$0xff] }
  0xd5   : > { %v2733_v18 = vsel %vm745_vm6, 1.0, %v4969_v14  ;;  %v2732_v19 = vsel %vm744_vm7, 1.0, %v4969_v14 }
  0xd6   : > { %3109 = vmatprep.mubr.msk.f32.mxu1 %vm788_vm0, %v2732_v19  ;;  %v1451_v19 = vld [vmem:[%s4939_s5 + $0x60] sm:$0xff] }
  0xd7   : > { %v715_v20 = vpop.permute.xlu1 %714  ;;  %3110 = vmatmul.mubr.msk.f32.gmra.mxu1 %vm788_vm0, %v2733_v18  ;;  %v712_v21 = vpop.permute.xlu0 %711  ;;  %v1452_v18 = vld [vmem:[%s4939_s5 + $0x68] sm:$0xff] }
  0xd8   : > { %vm747_vm8 = vcmp.eq.s32.totalorder %v3957_v38, %v715_v20  ;;  %vm746_vm9 = vcmp.eq.s32.totalorder %v3957_v38, %v712_v21  ;;  %v1450_v20 = vld [vmem:[%s4939_s5 + $0x58] sm:$0xff]  ;;  %v1449_v21 = vld [vmem:[%s4939_s5 + $0x50] sm:$0xff] }
  0xd9   : > { %v2735_v22 = vsel %vm747_vm8, 1.0, %v4969_v14  ;;  %v2734_v23 = vsel %vm746_vm9, 1.0, %v4969_v14 }
  0xda   : > { %3112 = vmatprep.mubr.msk.f32.mxu1 %vm788_vm0, %v2734_v23  ;;  %v1447_v23 = vld [vmem:[%s4939_s5 + $0x40] sm:$0xff] }
  0xdb   : > { %v721_v24 = vpop.permute.xlu1 %720  ;;  %3113 = vmatmul.mubr.msk.f32.gmra.mxu1 %vm788_vm0, %v2735_v22  ;;  %v718_v25 = vpop.permute.xlu0 %717  ;;  %v1448_v22 = vld [vmem:[%s4939_s5 + $0x48] sm:$0xff] }
  0xdc   : > { %vm749_vm10 = vcmp.eq.s32.totalorder %v3957_v38, %v721_v24  ;;  %vm748_vm11 = vcmp.eq.s32.totalorder %v3957_v38, %v718_v25  ;;  %v1446_v24 = vld [vmem:[%s4939_s5 + $0x38] sm:$0xff]  ;;  %v1445_v25 = vld [vmem:[%s4939_s5 + $0x30] sm:$0xff] }
  0xdd   : > { %v2737_v26 = vsel %vm749_vm10, 1.0, %v4969_v14  ;;  %v2736_v27 = vsel %vm748_vm11, 1.0, %v4969_v14  ;;  %vm4966_vm11 = vcmask 64512  }
  0xde   : > { %3115 = vmatprep.mubr.msk.f32.mxu1 %vm788_vm0, %v2736_v27  ;;  %v1443_v27 = vld [vmem:[%s4939_s5 + $0x20] sm:$0xff] }
  0xdf   : > { %v727_v28 = vpop.permute.xlu1 %726  ;;  %3116 = vmatmul.mubr.msk.f32.gmra.mxu1 %vm788_vm0, %v2737_v26  ;;  %v724_v29 = vpop.permute.xlu0 %723  ;;  %v1444_v26 = vld [vmem:[%s4939_s5 + $0x28] sm:$0xff] }
  0xe0   : > { %vm751_vm12 = vcmp.eq.s32.totalorder %v3957_v38, %v727_v28  ;;  %vm750_vm13 = vcmp.eq.s32.totalorder %v3957_v38, %v724_v29  ;;  %v1442_v28 = vld [vmem:[%s4939_s5 + $0x18] sm:$0xff]  ;;  %v1441_v29 = vld [vmem:[%s4939_s5 + $0x10] sm:$0xff] }
  0xe1   : > { %v2739_v30 = vsel %vm751_vm12, 1.0, %v4969_v14  ;;  %v2738_v31 = vsel %vm750_vm13, 1.0, %v4969_v14 }
  0xe2   : > { %3118 = vmatprep.mubr.msk.f32.mxu1 %vm788_vm0, %v2738_v31  ;;  %v1437_v31 = vld [vmem:[%s4938_s4 + $0x70] sm:$0xff] }
  0xe3   : > { %v733_v32 = vpop.permute.xlu1 %732  ;;  %3119 = vmatmul.mubr.msk.f32.gmra.mxu1 %vm788_vm0, %v2739_v30  ;;  %v730_v33 = vpop.permute.xlu0 %729  ;;  %v1438_v30 = vld [vmem:[%s4938_s4 + $0x78] sm:$0xff] }
  0xe4   : > { %vm753_vm14 = vcmp.eq.s32.totalorder %v3957_v38, %v733_v32  ;;  %vm752_vm15 = vcmp.eq.s32.totalorder %v3957_v38, %v730_v33  ;;  %v1440_v32 = vld [vmem:[%s4939_s5 + $0x8] sm:$0xff] }
  0xe5   : > { %v2741_v34 = vsel %vm753_vm14, 1.0, %v4969_v14  ;;  %v2740_v35 = vsel %vm752_vm15, 1.0, %v4969_v14  ;;  %v1436_v33 = vld [vmem:[%s4938_s4 + $0x68] sm:$0xff] }
  0xe6   : > { %3121 = vmatprep.mubr.msk.f32.mxu1 %vm788_vm0, %v2740_v35  ;;  %v1435_v35 = vld [vmem:[%s4938_s4 + $0x60] sm:$0xff] }
  0xe7   : > { %v739_v36 = vpop.permute.xlu1 %738  ;;  %3122 = vmatmul.mubr.msk.f32.gmra.mxu1 %vm788_vm0, %v2741_v34  ;;  %v736_v39 = vpop.permute.xlu0 %735  ;;  %v1439_v34 = vld [vmem:[%s4939_s5] sm:$0xff] }
  0xe8   : > { %vm755_vm1 = vcmp.eq.s32.totalorder %v3957_v38, %v739_v36  ;;  %vm754_vm2 = vcmp.eq.s32.totalorder %v3957_v38, %v736_v39  ;;  %v1434_v36 = vld [vmem:[%s4938_s4 + $0x58] sm:$0xff]  ;;  %v1433_v39 = vld [vmem:[%s4938_s4 + $0x50] sm:$0xff] }
  0xe9   : > { %v2743_v40 = vsel %vm755_vm1, 1.0, %v4969_v14  ;;  %v2742_v41 = vsel %vm754_vm2, 1.0, %v4969_v14 }
  0xea   : > { %3124 = vmatprep.mubr.msk.f32.mxu1 %vm788_vm0, %v2742_v41  ;;  %v1431_v41 = vld [vmem:[%s4938_s4 + $0x40] sm:$0xff] }
  0xeb   : > { %3125 = vmatmul.mubr.msk.f32.gmra.mxu1 %vm788_vm0, %v2743_v40  ;;  %vm1178_vm0 = vcmp.ge.s32.totalorder %v3957_v38, %v1177_v6  ;;  %v1432_v40 = vld [vmem:[%s4938_s4 + $0x48] sm:$0xff]  ;;  %v1714_v6 = vld [vmem:[%s4943_s9 + $0x60] sm:$0xff] }
  0xec   : > { %3194 = vmatprep.mubr.msk.f32.mxu1 %vm4964_vm3, %v4969_v14  ;;  %vm4143_vm5 = vmand %vm1178_vm0, %vm1181_vm4 }
  0xed   : > { %v4991_v12 = vsel %vm4143_vm5, 4294967295, %v4990_v12 }
 0x172   : > { %v4059_v42 = vpop.f32.mrf.mxu0 }
 0x174   : > { %v4061_v43 = vpop.f32.mrf.mxu0 }
 0x176   : > { %v4063_v44 = vpop.f32.mrf.mxu0 }
 0x178   : > { %v4065_v45 = vpop.f32.mrf.mxu0 }
 0x17a   : > { %v4067_v46 = vpop.f32.mrf.mxu0 }
 0x17c   : > { %v4069_v47 = vpop.f32.mrf.mxu0 }
 0x17e   : > { %v4071_v48 = vpop.f32.mrf.mxu0 }
 0x180   : > { %v4073_v49 = vpop.f32.mrf.mxu0 }
 0x182   : > { %v4075_v50 = vpop.f32.mrf.mxu0 }
 0x184   : > { %v4077_v51 = vpop.f32.mrf.mxu0 }
 0x186   : > { %v4079_v52 = vpop.f32.mrf.mxu0 }
 0x188   : > { %v4081_v53 = vpop.f32.mrf.mxu0 }
 0x18a   : > { %v4083_v54 = vpop.f32.mrf.mxu0 }
 0x18c   : > { %v4085_v55 = vpop.f32.mrf.mxu0 }
 0x18e   : > { %v4087_v56 = vpop.f32.mrf.mxu0 }
 0x18f   : > { %v4089_v57 = vpop.f32.mrf.mxu1  ;;  %3128 = vmatpush3.msra.mxu0 %v4087_v56 }
 0x190   : > { %v4092_v58 = vpop.f32.mrf.mxu0  ;;  %3129 = vmatprep.subr.mxu0 %v4969_v14 }
 0x191   : > { %v4095_v59 = vpop.f32.mrf.mxu1  ;;  %3130 = vmatpush3.msra.mxu0 %v4092_v58 }
 0x192   : > { %3131 = vmatprep.subr.mxu0 %v4969_v14 }
 0x193   : > { %v4099_v60 = vpop.f32.mrf.mxu1  ;;  %3132 = vmatpush3.msra.mxu0 %v4083_v54 }
 0x194   : > { %3133 = vmatprep.subr.mxu0 %v4969_v14 }
 0x195   : > { %v4103_v61 = vpop.f32.mrf.mxu1  ;;  %3134 = vmatpush3.msra.mxu0 %v4085_v55 }
 0x196   : > { %3135 = vmatprep.subr.mxu0 %v4969_v14 }
 0x197   : > { %v4107_v62 = vpop.f32.mrf.mxu1  ;;  %3136 = vmatpush3.msra.mxu0 %v4079_v52 }
 0x198   : > { %3137 = vmatprep.subr.mxu0 %v4969_v14 }
 0x199   : > { %v4111_v63 = vpop.f32.mrf.mxu1  ;;  %3138 = vmatpush3.msra.mxu0 %v4081_v53 }
 0x19a   : > { %3139 = vmatprep.subr.mxu0 %v4969_v14 }
 0x19b   : > { %v4115_v0 = vpop.f32.mrf.mxu1  ;;  %3140 = vmatpush3.msra.mxu0 %v4075_v50 }
 0x19c   : > { %3141 = vmatprep.subr.mxu0 %v4969_v14 }
 0x19d   : > { %v4122_v2 = vpop.f32.mrf.mxu1  ;;  %3142 = vmatpush3.msra.mxu0 %v4077_v51 }
 0x19e   : > { %3143 = vmatprep.subr.mxu0 %v4969_v14 }
 0x19f   : > { %v3117_v3 = vpop.f32.mrf.mxu1  ;;  %3144 = vmatpush3.msra.mxu0 %v4071_v48 }
 0x1a0   : > { %3145 = vmatprep.subr.mxu0 %v4969_v14 }
 0x1a1   : > { %v1136_v5 = vpop.f32.mrf.mxu1  ;;  %3146 = vmatpush3.msra.mxu0 %v4073_v49 }
 0x1a2   : > { %3147 = vmatprep.subr.mxu0 %v4969_v14 }
 0x1a3   : > { %v3120_v37 = vpop.f32.mrf.mxu1  ;;  %3148 = vmatpush3.msra.mxu0 %v4067_v46 }
 0x1a4   : > { %3149 = vmatprep.subr.mxu0 %v4969_v14 }
 0x1a5   : > { %v1146_v8 = vpop.f32.mrf.mxu1  ;;  %3150 = vmatpush3.msra.mxu0 %v4069_v47 }
 0x1a6   : > { %3151 = vmatprep.subr.mxu0 %v4969_v14 }
 0x1a7   : > { %v3123_v9 = vpop.f32.mrf.mxu1  ;;  %3152 = vmatpush3.msra.mxu0 %v4063_v44 }
 0x1a8   : > { %3153 = vmatprep.subr.mxu0 %v4969_v14 }
 0x1a9   : > { %v1156_v10 = vpop.f32.mrf.mxu1  ;;  %3154 = vmatpush3.msra.mxu0 %v4065_v45 }
 0x1aa   : > { %3155 = vmatprep.subr.mxu0 %v4969_v14 }
 0x1ab   : > { %v3126_v11 = vpop.f32.mrf.mxu1  ;;  %3156 = vmatpush3.msra.mxu0 %v4059_v42 }
 0x1ac   : > { %3157 = vmatprep.subr.mxu0 %v4969_v14  ;;  %3163 = vmatpush3.msra.mxu1 %v3126_v11  ;;  %v1709_v11 = vld [vmem:[%s4943_s9 + $0x38] sm:$0xff] }
 0x1ad   : > { %v1166_v13 = vpop.f32.mrf.mxu1  ;;  %3158 = vmatpush3.msra.mxu0 %v4061_v43  ;;  %3164 = vmatprep.subr.mxu1 %v4969_v14 }
 0x1ae   : > { %3160 = vmatmul.mubr.msk.f32.vlgmr.msra.gmra.mxu0 %vm4143_vm5, %v4968_v16  ;;  %3165 = vmatpush3.msra.mxu1 %v1166_v13  ;;  %v1708_v13 = vld [vmem:[%s4943_s9 + $0x30] sm:$0xff] }
 0x1af   : > { %3166 = vmatprep.subr.mxu1 %v4969_v14  ;;  %3197 = vmatprep.subr.mxu0 %v4969_v14 }
 0x1b0   : > { %3167 = vmatpush3.msra.mxu1 %v3123_v9  ;;  %3198 = vmatpush3.msra.mxu0 %v1454_v15  ;;  %v1711_v9 = vld [vmem:[%s4943_s9 + $0x48] sm:$0xff] }
 0x1b1   : > { %3168 = vmatprep.subr.mxu1 %v4969_v14  ;;  %3199 = vmatprep.subr.mxu0 %v4969_v14  ;;  %v1707_v15 = vld [vmem:[%s4943_s9 + $0x28] sm:$0xff] }
 0x1b2   : > { %3169 = vmatpush3.msra.mxu1 %v1156_v10  ;;  %3200 = vmatpush3.msra.mxu0 %v1453_v17  ;;  %v1710_v10 = vld [vmem:[%s4943_s9 + $0x40] sm:$0xff] }
 0x1b3   : > { %3170 = vmatprep.subr.mxu1 %v4969_v14  ;;  %3201 = vmatprep.subr.mxu0 %v4969_v14  ;;  %v1706_v17 = vld [vmem:[%s4943_s9 + $0x20] sm:$0xff] }
 0x1b4   : > { %3171 = vmatpush3.msra.mxu1 %v3120_v37  ;;  %3202 = vmatpush3.msra.mxu0 %v1452_v18  ;;  %v1715_v37 = vld [vmem:[%s4943_s9 + $0x68] sm:$0xff]  ;;  %v1705_v18 = vld [vmem:[%s4943_s9 + $0x18] sm:$0xff] }
 0x1b5   : > { %3172 = vmatprep.subr.mxu1 %v4969_v14  ;;  %3203 = vmatprep.subr.mxu0 %v4969_v14 }
 0x1b6   : > { %3173 = vmatpush3.msra.mxu1 %v1146_v8  ;;  %3204 = vmatpush3.msra.mxu0 %v1451_v19  ;;  %v1712_v8 = vld [vmem:[%s4943_s9 + $0x50] sm:$0xff] }
 0x1b7   : > { %3174 = vmatprep.subr.mxu1 %v4969_v14  ;;  %3205 = vmatprep.subr.mxu0 %v4969_v14  ;;  %v1704_v19 = vld [vmem:[%s4943_s9 + $0x10] sm:$0xff] }
 0x1b8   : > { %3175 = vmatpush3.msra.mxu1 %v3117_v3  ;;  %3206 = vmatpush3.msra.mxu0 %v1450_v20  ;;  %v4311_v3 = vld [vmem:[%s3903_s20] sm:$0xff]  ;;  %v1703_v20 = vld [vmem:[%s4943_s9 + $0x8] sm:$0xff] }
 0x1b9   : > { %3176 = vmatprep.subr.mxu1 %v4969_v14  ;;  %3207 = vmatprep.subr.mxu0 %v4969_v14 }
 0x1ba   : > { %3177 = vmatpush3.msra.mxu1 %v1136_v5  ;;  %3208 = vmatpush3.msra.mxu0 %v1449_v21  ;;  %v1716_v5 = vld [vmem:[%s4943_s9 + $0x70] sm:$0xff]  ;;  %v1702_v21 = vld [vmem:[%s4943_s9] sm:$0xff] }
 0x1bb   : > { %3178 = vmatprep.subr.mxu1 %v4969_v14  ;;  %3209 = vmatprep.subr.mxu0 %v4969_v14 }
 0x1bc   : > { %3179 = vmatpush3.msra.mxu1 %v4115_v0  ;;  %3210 = vmatpush3.msra.mxu0 %v1448_v22  ;;  %v1424_v0 = vld [vmem:[%s4938_s4 + $0x8] sm:$0xff]  ;;  %v1624_v22 = vld [vmem:[%s4941_s7 + $0x78] sm:$0xff] }
 0x1bd   : > { %3180 = vmatprep.subr.mxu1 %v4969_v14  ;;  %3211 = vmatprep.subr.mxu0 %v4969_v14 }
 0x1be   : > { %3181 = vmatpush3.msra.mxu1 %v4122_v2  ;;  %3212 = vmatpush3.msra.mxu0 %v1447_v23  ;;  %v1423_v2 = vld [vmem:[%s4938_s4] sm:$0xff] }
 0x1bf   : > { %3182 = vmatprep.subr.mxu1 %v4969_v14  ;;  %3213 = vmatprep.subr.mxu0 %v4969_v14 }
 0x1c0   : > { %3183 = vmatpush3.msra.mxu1 %v4107_v62  ;;  %3214 = vmatpush3.msra.mxu0 %v1446_v24  ;;  %v1426_v62 = vld [vmem:[%s4938_s4 + $0x18] sm:$0xff]  ;;  %v1623_v24 = vld [vmem:[%s4941_s7 + $0x70] sm:$0xff] }
 0x1c1   : > { %3184 = vmatprep.subr.mxu1 %v4969_v14  ;;  %3215 = vmatprep.subr.mxu0 %v4969_v14 }
 0x1c2   : > { %3185 = vmatpush3.msra.mxu1 %v4111_v63  ;;  %3216 = vmatpush3.msra.mxu0 %v1445_v25  ;;  %v1425_v63 = vld [vmem:[%s4938_s4 + $0x10] sm:$0xff] }
 0x1c3   : > { %3186 = vmatprep.subr.mxu1 %v4969_v14  ;;  %3217 = vmatprep.subr.mxu0 %v4969_v14 }
 0x1c4   : > { %3187 = vmatpush3.msra.mxu1 %v4099_v60  ;;  %3218 = vmatpush3.msra.mxu0 %v1444_v26  ;;  %v1428_v60 = vld [vmem:[%s4938_s4 + $0x28] sm:$0xff] }
 0x1c5   : > { %3188 = vmatprep.subr.mxu1 %v4969_v14  ;;  %3219 = vmatprep.subr.mxu0 %v4969_v14  ;;  %v1622_v26 = vld [vmem:[%s4941_s7 + $0x68] sm:$0xff] }
 0x1c6   : > { %3189 = vmatpush3.msra.mxu1 %v4103_v61  ;;  %3220 = vmatpush3.msra.mxu0 %v1443_v27  ;;  %v1427_v61 = vld [vmem:[%s4938_s4 + $0x20] sm:$0xff] }
 0x1c7   : > { %3190 = vmatprep.subr.mxu1 %v4969_v14  ;;  %3221 = vmatprep.subr.mxu0 %v4969_v14  ;;  %v1621_v27 = vld [vmem:[%s4941_s7 + $0x60] sm:$0xff] }
 0x1c8   : > { %3191 = vmatpush3.msra.mxu1 %v4089_v57  ;;  %3222 = vmatpush3.msra.mxu0 %v1442_v28  ;;  %v1430_v57 = vld [vmem:[%s4938_s4 + $0x38] sm:$0xff] }
 0x1c9   : > { %3192 = vmatprep.subr.mxu1 %v4969_v14  ;;  %3223 = vmatprep.subr.mxu0 %v4969_v14  ;;  %v1620_v28 = vld [vmem:[%s4941_s7 + $0x58] sm:$0xff] }
 0x1ca   : > { %3193 = vmatpush3.msra.mxu1 %v4095_v59  ;;  %3224 = vmatpush3.msra.mxu0 %v1441_v29  ;;  %v1429_v59 = vld [vmem:[%s4938_s4 + $0x30] sm:$0xff] }
 0x1cb   : > { %3232 = vmatprep.subr.mxu1 %v4969_v14  ;;  %3195 = vmatmul.mubr.msk.f32.vlgmr.msra.gmra.mxu1 %vm4143_vm5, %v4968_v16  ;;  %v1619_v29 = vld [vmem:[%s4941_s7 + $0x50] sm:$0xff] }
 0x1cc   : > { %3233 = vmatpush3.msra.mxu1 %v1438_v30  ;;  %3264 = vmatprep.mubr.msk.f32.mxu1 %vm4964_vm3, %v4969_v14  ;;  %v1618_v30 = vld [vmem:[%s4941_s7 + $0x48] sm:$0xff] }
 0x1cd   : > { %3234 = vmatprep.subr.mxu1 %v4969_v14  ;;  %3225 = vmatprep.subr.mxu0 %v4969_v14 }
 0x1ce   : > { %3235 = vmatpush3.msra.mxu1 %v1437_v31  ;;  %3226 = vmatpush3.msra.mxu0 %v1440_v32  ;;  %v1617_v31 = vld [vmem:[%s4941_s7 + $0x40] sm:$0xff]  ;;  %v1616_v32 = vld [vmem:[%s4941_s7 + $0x38] sm:$0xff] }
 0x1cf   : > { %3236 = vmatprep.subr.mxu1 %v4969_v14  ;;  %3227 = vmatprep.subr.mxu0 %v4969_v14 }
 0x1d0   : > { %3237 = vmatpush3.msra.mxu1 %v1436_v33  ;;  %3228 = vmatpush3.msra.mxu0 %v1439_v34  ;;  %v1615_v33 = vld [vmem:[%s4941_s7 + $0x30] sm:$0xff]  ;;  %v1614_v34 = vld [vmem:[%s4941_s7 + $0x28] sm:$0xff] }
 0x1d1   : > { %3238 = vmatprep.subr.mxu1 %v4969_v14  ;;  %3229 = vmatprep.mubr.msk.f32.mxu0 %vm4964_vm3, %v4969_v14 }
 0x1d2   : > { %3239 = vmatpush3.msra.mxu1 %v1435_v35  ;;  %3267 = vmatprep.subr.mxu0 %v4969_v14  ;;  %v1613_v35 = vld [vmem:[%s4941_s7 + $0x20] sm:$0xff] }
 0x1d3   : > { %3240 = vmatprep.subr.mxu1 %v4969_v14 }
 0x1d4   : > { %3241 = vmatpush3.msra.mxu1 %v1434_v36  ;;  %v1612_v36 = vld [vmem:[%s4941_s7 + $0x18] sm:$0xff] }
 0x1d5   : > { %3242 = vmatprep.subr.mxu1 %v4969_v14 }
 0x1d6   : > { %3243 = vmatpush3.msra.mxu1 %v1433_v39  ;;  %v1611_v39 = vld [vmem:[%s4941_s7 + $0x10] sm:$0xff] }
 0x1d7   : > { %3244 = vmatprep.subr.mxu1 %v4969_v14 }
 0x1d8   : > { %3245 = vmatpush3.msra.mxu1 %v1432_v40  ;;  %v1610_v40 = vld [vmem:[%s4941_s7 + $0x8] sm:$0xff] }
 0x1d9   : > { %3246 = vmatprep.subr.mxu1 %v4969_v14 }
 0x1da   : > { %3247 = vmatpush3.msra.mxu1 %v1431_v41  ;;  %v1609_v41 = vld [vmem:[%s4941_s7] sm:$0xff] }
 0x1db   : > { %3248 = vmatprep.subr.mxu1 %v4969_v14 }
 0x1dc   : > { %3249 = vmatpush3.msra.mxu1 %v1430_v57 }
 0x1dd   : > { %3250 = vmatprep.subr.mxu1 %v4969_v14 }
 0x1de   : > { %3251 = vmatpush3.msra.mxu1 %v1429_v59 }
 0x1df   : > { %3252 = vmatprep.subr.mxu1 %v4969_v14 }
 0x1e0   : > { %3253 = vmatpush3.msra.mxu1 %v1428_v60 }
 0x1e1   : > { %3254 = vmatprep.subr.mxu1 %v4969_v14 }
 0x1e2   : > { %3255 = vmatpush3.msra.mxu1 %v1427_v61 }
 0x1e3   : > { %3256 = vmatprep.subr.mxu1 %v4969_v14 }
 0x1e4   : > { %3257 = vmatpush3.msra.mxu1 %v1426_v62  ;;  %v1217_v62 = vadd.s32 1, %v3957_v38 }
 0x1e5   : > { %3258 = vmatprep.subr.mxu1 %v4969_v14 }
 0x1e6   : > { %3259 = vmatpush3.msra.mxu1 %v1425_v63  ;;  %v4457_v63 = vmul.u32 16, %v3957_v38 }
 0x1e7   : > { %3260 = vmatprep.subr.mxu1 %v4969_v14 }
 0x1e8   : > { %3261 = vmatpush3.msra.mxu1 %v1424_v0  ;;  %v4459_v0 = vmul.u32 16, %v1217_v62  ;;  %vm1201_vm6 = vcmp.ge.s32.totalorder %v4120_v1, %v4457_v63 }
 0x1e9   : > { %3262 = vmatprep.subr.mxu1 %v4969_v14 }
 0x1ea   : > { %3263 = vmatpush3.msra.mxu1 %v1423_v2  ;;  %v4462_v2 = vadd.s32 8, %v4120_v1  ;;  %vm1219_vm7 = vcmp.lt.s32.totalorder %v4120_v1, %v4459_v0 }
 0x1eb   : > { %3265 = vmatmul.mubr.f32.vlgmr.msra.gmra.mxu1 %v4311_v3  ;;  %3302 = vmatprep.subr.mxu1 %v1717_v4  ;;  %vm1235_vm8 = vmand %vm1201_vm6, %vm1219_vm7 }
 0x1ec   : > { %3303 = vmatpush3.msra.mxu1 %v1717_v4  ;;  %3334 = vmatprep.mubr.f32.mxu1 %v4061_v43  ;;  %4994 = vst [vmem:[#allocation20_spill] sm:$0xff] %v4462_v2  ;;  %vm1202_vm9 = vcmp.ge.s32.totalorder %v4462_v2, %v4457_v63  ;;  %vm1220_vm10 = vcmp.lt.s32.totalorder %v4462_v2, %v4459_v0  ;;  %v2777_v38 = vsel %vm1235_vm8, 1.0, %v4969_v14  ;;  %v1186_v4 = vadd.s32 16, %v4120_v1 }
 0x1ed   : > { %3304 = vmatprep.subr.mxu1 %v1716_v5  ;;  %vm4473_vm12 = vmand %vm1202_vm9, %vm1220_vm10 }
 0x1ee   : > { %3305 = vmatpush3.msra.mxu1 %v1716_v5  ;;  %v1187_v5 = vadd.s32 24, %v4120_v1  ;;  %vm1203_vm13 = vcmp.ge.s32.totalorder %v1186_v4, %v4457_v63  ;;  %vm1221_vm14 = vcmp.lt.s32.totalorder %v1186_v4, %v4459_v0 }
 0x1ef   : > { %3306 = vmatprep.subr.mxu1 %v1715_v37  ;;  %vm4482_vm15 = vmand %vm1203_vm13, %vm1221_vm14 }
 0x1f0   : > { %3307 = vmatpush3.msra.mxu1 %v1715_v37  ;;  %vm1204_vm1 = vcmp.ge.s32.totalorder %v1187_v5, %v4457_v63  ;;  %vm1222_vm2 = vcmp.lt.s32.totalorder %v1187_v5, %v4459_v0 }
 0x1f1   : > { %3308 = vmatprep.subr.mxu1 %v1714_v6  ;;  %vm4488_vm0 = vmand %vm1204_vm1, %vm1222_vm2 }
 0x1f2   : > { %3309 = vmatpush3.msra.mxu1 %v1714_v6  ;;  %v2780_v62 = vsel %vm4488_vm0, 1.0, %v4969_v14 }
 0x1f3   : > { %3310 = vmatprep.subr.mxu1 %v1713_v7 }
 0x1f4   : > { %3311 = vmatpush3.msra.mxu1 %v1713_v7  ;;  %v1188_v7 = vadd.s32 32, %v4120_v1 }
 0x1f5   : > { %3312 = vmatprep.subr.mxu1 %v1712_v8 }
 0x1f6   : > { %3313 = vmatpush3.msra.mxu1 %v1712_v8  ;;  %v1189_v8 = vadd.s32 40, %v4120_v1  ;;  %vm1205_vm4 = vcmp.ge.s32.totalorder %v1188_v7, %v4457_v63  ;;  %vm1223_vm6 = vcmp.lt.s32.totalorder %v1188_v7, %v4459_v0 }
 0x1f7   : > { %3314 = vmatprep.subr.mxu1 %v1711_v9  ;;  %vm4496_vm7 = vmand %vm1205_vm4, %vm1223_vm6 }
 0x1f8   : > { %3315 = vmatpush3.msra.mxu1 %v1711_v9  ;;  %vm1206_vm8 = vcmp.ge.s32.totalorder %v1189_v8, %v4457_v63  ;;  %vm1224_vm9 = vcmp.lt.s32.totalorder %v1189_v8, %v4459_v0 }
 0x1f9   : > { %3316 = vmatprep.subr.mxu1 %v1710_v10  ;;  %vm4502_vm10 = vmand %vm1206_vm8, %vm1224_vm9 }
 0x1fa   : > { %3317 = vmatpush3.msra.mxu1 %v1710_v10 }
 0x1fb   : > { %3318 = vmatprep.subr.mxu1 %v1709_v11 }
 0x1fc   : > { %3319 = vmatpush3.msra.mxu1 %v1709_v11  ;;  %v1190_v11 = vadd.s32 48, %v4120_v1 }
 0x1fd   : > { %3320 = vmatprep.subr.mxu1 %v1708_v13 }
 0x1fe   : > { %3321 = vmatpush3.msra.mxu1 %v1708_v13  ;;  %v1191_v13 = vadd.s32 56, %v4120_v1  ;;  %vm1207_vm13 = vcmp.ge.s32.totalorder %v1190_v11, %v4457_v63  ;;  %vm1225_vm14 = vcmp.lt.s32.totalorder %v1190_v11, %v4459_v0 }
 0x1ff   : > { %3322 = vmatprep.subr.mxu1 %v1707_v15  ;;  %vm4510_vm1 = vmand %vm1207_vm13, %vm1225_vm14 }
 0x200   : > { %3323 = vmatpush3.msra.mxu1 %v1707_v15  ;;  %vm1208_vm2 = vcmp.ge.s32.totalorder %v1191_v13, %v4457_v63  ;;  %vm1226_vm4 = vcmp.lt.s32.totalorder %v1191_v13, %v4459_v0  ;;  %v2270_v13 = vld [vmem:[%s4945_s11 + $0x78] sm:$0xff]  ;;  %v2269_v15 = vld [vmem:[%s4945_s11 + $0x70] sm:$0xff] }
 0x201   : > { %3324 = vmatprep.subr.mxu1 %v1706_v17  ;;  %vm4516_vm6 = vmand %vm1208_vm2, %vm1226_vm4 }
 0x202   : > { %3325 = vmatpush3.msra.mxu1 %v1706_v17 }
 0x203   : > { %3326 = vmatprep.subr.mxu1 %v1705_v18 }
 0x204   : > { %3327 = vmatpush3.msra.mxu1 %v1705_v18  ;;  %v1192_v18 = vadd.s32 64, %v4120_v1 }
 0x205   : > { %3328 = vmatprep.subr.mxu1 %v1704_v19 }
 0x206   : > { %3329 = vmatpush3.msra.mxu1 %v1704_v19  ;;  %v1193_v19 = vadd.s32 72, %v4120_v1  ;;  %vm1209_vm8 = vcmp.ge.s32.totalorder %v1192_v18, %v4457_v63  ;;  %vm1227_vm9 = vcmp.lt.s32.totalorder %v1192_v18, %v4459_v0  ;;  %v2268_v18 = vld [vmem:[%s4945_s11 + $0x68] sm:$0xff] }
 0x207   : > { %3330 = vmatprep.subr.mxu1 %v1703_v20  ;;  %vm4524_vm13 = vmand %vm1209_vm8, %vm1227_vm9 }
 0x208   : > { %3331 = vmatpush3.msra.mxu1 %v1703_v20  ;;  %vm1210_vm14 = vcmp.ge.s32.totalorder %v1193_v19, %v4457_v63  ;;  %v2785_v4 = vsel %vm4524_vm13, 1.0, %v4969_v14 }
 0x209   : > { %3332 = vmatprep.subr.mxu1 %v1702_v21 }
 0x20a   : > { %3333 = vmatpush3.msra.mxu1 %v1702_v21  ;;  %v5011_v21 = vmov 0 }
 0x20b   : > { %3335 = vmatmul.mubr.f32.vlgmr.msra.gmra.mxu1 %v4059_v42  ;;  %3384 = vmatprep.subr.mxu1 %v4969_v14 }
 0x20c   : > { %3337 = vmatprep.mubr.f32.mxu1 %v4065_v45 }
 0x20f   : > { %3338 = vmatmul.mubr.f32.gmra.mxu1 %v4063_v44 }
 0x210   : > { %3340 = vmatprep.mubr.f32.mxu1 %v4069_v47 }
 0x213   : > { %3341 = vmatmul.mubr.f32.gmra.mxu1 %v4067_v46 }
 0x214   : > { %3343 = vmatprep.mubr.f32.mxu1 %v4073_v49 }
 0x217   : > { %3344 = vmatmul.mubr.f32.gmra.mxu1 %v4071_v48 }
 0x218   : > { %3346 = vmatprep.mubr.f32.mxu1 %v4077_v51 }
 0x21b   : > { %3347 = vmatmul.mubr.f32.gmra.mxu1 %v4075_v50 }
 0x21c   : > { %3349 = vmatprep.mubr.f32.mxu1 %v4081_v53 }
 0x21f   : > { %3350 = vmatmul.mubr.f32.gmra.mxu1 %v4079_v52 }
 0x220   : > { %3352 = vmatprep.mubr.f32.mxu1 %v4085_v55 }
 0x223   : > { %3353 = vmatmul.mubr.f32.gmra.mxu1 %v4083_v54 }
 0x224   : > { %3355 = vmatprep.mubr.f32.mxu1 %v4092_v58 }
 0x227   : > { %3356 = vmatmul.mubr.f32.gmra.mxu1 %v4087_v56 }
 0x228   : > { %3416 = vmatprep.mubr.msk.f32.mxu1 %vm4964_vm3, %v4969_v14 }
 0x26e   : > { %v4385_v23 = vpop.f32.mrf.mxu0 }
 0x26f   : > { %4992 = vst [vmem:[#allocation18_spill] sm:$0xff] %v4385_v23  ;;  %3230 = vmatmul.mubr.f32.vlgmr.msra.gmra.mxu0 %v4385_v23 }
 0x270   : > { %3268 = vmatpush3.msra.mxu0 %v1624_v22  ;;  %v3161_v25 = vpop.f32.mrf.mxu0  ;;  %3299 = vmatprep.mubr.msk.f32.mxu0 %vm4964_vm3, %v4969_v14  ;;  %vm1228_vm3 = vcmp.lt.s32.totalorder %v1193_v19, %v4459_v0  ;;  %v1194_v22 = vadd.s32 80, %v4120_v1  ;;  %v2267_v19 = vld [vmem:[%s4945_s11 + $0x60] sm:$0xff] }
 0x271   : > { %3269 = vmatprep.subr.mxu0 %v4969_v14  ;;  %vm4530_vm2 = vmand %vm1210_vm14, %vm1228_vm3  ;;  %v5013_v25 = vmov 0 }
 0x272   : > { %3270 = vmatpush3.msra.mxu0 %v1623_v24  ;;  %v5012_v21 = vsel %vm4530_vm2, 4294967295, %v5011_v21  ;;  %v1195_v24 = vadd.s32 88, %v4120_v1  ;;  %vm1211_vm4 = vcmp.ge.s32.totalorder %v1194_v22, %v4457_v63 }
 0x273   : > { %3271 = vmatprep.subr.mxu0 %v4969_v14 }
 0x274   : > { %3272 = vmatpush3.msra.mxu0 %v1622_v26  ;;  %vm1212_vm9 = vcmp.ge.s32.totalorder %v1195_v24, %v4457_v63  ;;  %vm1230_vm5 = vcmp.lt.s32.totalorder %v1195_v24, %v4459_v0  ;;  %v5015_v26 = vmov 0 }
 0x275   : > { %3273 = vmatprep.subr.mxu0 %v4969_v14  ;;  %vm4544_vm3 = vmand %vm1212_vm9, %vm1230_vm5 }
 0x276   : > { %3274 = vmatpush3.msra.mxu0 %v1621_v27  ;;  %v5016_v26 = vsel %vm4544_vm3, 4294967295, %v5015_v26  ;;  %v1196_v27 = vadd.s32 96, %v4120_v1 }
 0x277   : > { %3275 = vmatprep.subr.mxu0 %v4969_v14 }
 0x278   : > { %3276 = vmatpush3.msra.mxu0 %v1620_v28  ;;  %v1197_v28 = vadd.s32 104, %v4120_v1  ;;  %vm1213_vm14 = vcmp.ge.s32.totalorder %v1196_v27, %v4457_v63  ;;  %vm1231_vm2 = vcmp.lt.s32.totalorder %v1196_v27, %v4459_v0 }
 0x279   : > { %3277 = vmatprep.subr.mxu0 %v4969_v14 }
 0x27a   : > { %3278 = vmatpush3.msra.mxu0 %v1619_v29  ;;  %v5017_v29 = vmov 0 }
 0x27b   : > { %3279 = vmatprep.subr.mxu0 %v4969_v14 }
 0x27c   : > { %3280 = vmatpush3.msra.mxu0 %v1618_v30 }
 0x27d   : > { %3281 = vmatprep.subr.mxu0 %v4969_v14 }
 0x27e   : > { %3282 = vmatpush3.msra.mxu0 %v1617_v31  ;;  %v1198_v31 = vadd.s32 112, %v4120_v1 }
 0x27f   : > { %3283 = vmatprep.subr.mxu0 %v4969_v14 }
 0x280   : > { %3284 = vmatpush3.msra.mxu0 %v1616_v32  ;;  %v1199_v32 = vadd.s32 120, %v4120_v1  ;;  %vm1215_vm9 = vcmp.ge.s32.totalorder %v1198_v31, %v4457_v63  ;;  %vm1233_vm3 = vcmp.lt.s32.totalorder %v1198_v31, %v4459_v0  ;;  %v2260_v31 = vld [vmem:[%s4945_s11 + $0x28] sm:$0xff] }
 0x281   : > { %3285 = vmatprep.subr.mxu0 %v4969_v14 }
 0x282   : > { %3286 = vmatpush3.msra.mxu0 %v1615_v33 }
 0x283   : > { %3287 = vmatprep.subr.mxu0 %v4969_v14 }
 0x284   : > { %3288 = vmatpush3.msra.mxu0 %v1614_v34  ;;  %v2258_v34 = vld [vmem:[%s4945_s11 + $0x18] sm:$0xff] }
 0x285   : > { %3289 = vmatprep.subr.mxu0 %v4969_v14 }
 0x286   : > { %3290 = vmatpush3.msra.mxu0 %v1613_v35 }
 0x287   : > { %3291 = vmatprep.subr.mxu0 %v4969_v14 }
 0x288   : > { %3292 = vmatpush3.msra.mxu0 %v1612_v36 }
 0x289   : > { %3293 = vmatprep.subr.mxu0 %v4969_v14 }
 0x28a   : > { %3294 = vmatpush3.msra.mxu0 %v1611_v39  ;;  %v2797_v39 = vld [vmem:[%s4942_s8] ss:$0 sm:$0xff] }
 0x28b   : > { %3295 = vmatprep.subr.mxu0 %v4969_v14  ;;  %v1419_v57 = vpop.f32.mrf.mxu1 }
 0x28c   : > { %3296 = vmatpush3.msra.mxu0 %v1610_v40  ;;  %2425 = vst [vmem:[%s532_s12] sm:$0xff] %v1419_v57 }
 0x28d   : > { %3297 = vmatprep.subr.mxu0 %v4969_v14  ;;  %v3196_v59 = vpop.f32.mrf.mxu1 }
 0x28e   : > { %3298 = vmatpush3.msra.mxu0 %v1609_v41  ;;  %v2778_v59 = vsel %vm4473_vm12, 1.0, %v4969_v14 }
 0x28f   : > { %3300 = vmatmul.mubr.f32.vlgmr.msra.gmra.mxu0 %v4311_v3  ;;  %v2784_v3 = vsel %vm4516_vm6, 1.0, %v4969_v14  ;;  %vm5037_vm6 = vnez %v5016_v26  ;;  %v2263_v26 = vld [vmem:[%s4945_s11 + $0x40] sm:$0xff] }
 0x290   : > { %3360 = vmatprep.mubr.msk.f32.mxu0 %vm4966_vm11, %v2777_v38  ;;  %vm1229_vm11 = vcmp.lt.s32.totalorder %v1194_v22, %v4459_v0  ;;  %v2783_v38 = vsel %vm4510_vm1, 1.0, %v4969_v14  ;;  %v2788_v6 = vsel %vm5037_vm6, 1.0, %v4969_v14  ;;  %v2265_v22 = vld [vmem:[%s4945_s11 + $0x50] sm:$0xff] }
 0x291   : > { %vm4538_vm8 = vmand %vm1211_vm4, %vm1229_vm11  ;;  %vm1214_vm4 = vcmp.ge.s32.totalorder %v1197_v28, %v4457_v63 }
 0x292   : > { %v5014_v25 = vsel %vm4538_vm8, 4294967295, %v5013_v25  ;;  %vm4552_vm11 = vmand %vm1213_vm14, %vm1231_vm2  ;;  %vm1232_vm8 = vcmp.lt.s32.totalorder %v1197_v28, %v4459_v0  ;;  %vm1216_vm14 = vcmp.ge.s32.totalorder %v1199_v32, %v4457_v63  ;;  %v2781_v63 = vsel %vm4496_vm7, 1.0, %v4969_v14  ;;  %v2262_v28 = vld [vmem:[%s4945_s11 + $0x38] sm:$0xff] }
 0x293   : > { %v5018_v29 = vsel %vm4552_vm11, 4294967295, %v5017_v29  ;;  %vm4558_vm5 = vmand %vm1214_vm4, %vm1232_vm8  ;;  %vm1234_vm11 = vcmp.lt.s32.totalorder %v1199_v32, %v4459_v0  ;;  %v2782_v0 = vsel %vm4502_vm10, 1.0, %v4969_v14  ;;  %vm5033_vm10 = vnez %v5012_v21  ;;  %v2266_v21 = vld [vmem:[%s4945_s11 + $0x58] sm:$0xff]  ;;  %v2259_v32 = vld [vmem:[%s4945_s11 + $0x20] sm:$0xff] }
 0x294   : > { %vm4566_vm2 = vmand %vm1215_vm9, %vm1233_vm3  ;;  %vm5025_vm3 = vcmask 64512   ;;  %v2786_v5 = vsel %vm5033_vm10, 1.0, %v4969_v14  ;;  %vm5034_vm1 = vnez %v5014_v25  ;;  %vm5038_vm13 = vnez %v5018_v29  ;;  %v2264_v25 = vld [vmem:[%s4945_s11 + $0x48] sm:$0xff]  ;;  %v2261_v29 = vld [vmem:[%s4945_s11 + $0x30] sm:$0xff] }
 0x295   : > { %vm4572_vm8 = vmand %vm1216_vm14, %vm1234_vm11  ;;  %v2787_v37 = vsel %vm5034_vm1, 1.0, %v4969_v14  ;;  %v2789_v7 = vsel %vm5038_vm13, 1.0, %v4969_v14  ;;  %v2790_v8 = vsel %vm4558_vm5, 1.0, %v4969_v14  ;;  %v2791_v9 = vsel %vm4566_vm2, 1.0, %v4969_v14 }
 0x296   : > { %vm5026_vm11 = vmmov %vm5025_vm3  ;;  %v2792_v10 = vsel %vm4572_vm8, 1.0, %v4969_v14  ;;  %vm5047_vm5 = vnez %v4991_v12  ;;  %v2250_v12 = vld [vmem:[%s4944_s10 + $0x58] sm:$0xff] }
 0x297   : > { %vm5027_vm12 = vmmov %vm5025_vm3 }
 0x298   : > { %vm5028_vm4 = vmmov %vm5025_vm3 }
 0x299   : > { %vm5030_vm9 = vmmov %vm5025_vm3 }
 0x29a   : > { %vm5031_vm0 = vmmov %vm5025_vm3 }
 0x29b   : > { %vm5032_vm7 = vmmov %vm5031_vm0 }
 0x29c   : > { %vm5035_vm14 = vmmov %vm5031_vm0 }
 0x2ab   : > { %v4453_v60 = vpop.f32.mrf.mxu1 }
 0x2ac   : > { %4993 = vst [vmem:[#allocation19_spill] sm:$0xff] %v4453_v60 }
 0x2ad   : > { %v3266_v61 = vpop.f32.mrf.mxu1 }
 0x2ae   : > { %v2779_v61 = vsel %vm4482_vm15, 1.0, %v4969_v14  ;;  %vm5029_vm15 = vmmov %vm5025_vm3 }
 0x2cb   : > { %v4644_v11 = vpop.f32.mrf.mxu1 }
 0x2cd   : > { %v4653_v17 = vpop.f32.mrf.mxu1 }
 0x2cf   : > { %v4663_v20 = vpop.f32.mrf.mxu1 }
 0x2d1   : > { %v4673_v24 = vpop.f32.mrf.mxu1 }
 0x2d3   : > { %v4683_v27 = vpop.f32.mrf.mxu1 }
 0x2d5   : > { %v4693_v30 = vpop.f32.mrf.mxu1 }
 0x2d7   : > { %v3345_v33 = vpop.f32.mrf.mxu1 }
 0x32f   : > { %v4576_v35 = vpop.f32.mrf.mxu0 }
 0x331   : > { %v3231_v36 = vpop.f32.mrf.mxu0 }
 0x332   : > { %v2257_v36 = vld [vmem:[%s4945_s11 + $0x10] sm:$0xff] }
 0x34f   : > { %v1698_v40 = vpop.f32.mrf.mxu0 }
 0x350   : > { %v1699_v41 = vadd.f32 %v2797_v39, %v1698_v40  ;;  %v1814_v39 = vpop.f32.mrf.mxu1  ;;  %v2256_v40 = vld [vmem:[%s4945_s11 + $0x8] sm:$0xff] }
 0x351   : > { %v3301_v57 = vpop.f32.mrf.mxu0 }
 0x352   : > { %3358 = vmatprep.subr.mxu0 %v1699_v41  ;;  %v3348_v57 = vpop.f32.mrf.mxu1 }
 0x353   : > { %3359 = vmatpush3.msra.mxu0 %v1699_v41 }
 0x354   : > { %3361 = vmatmul.mubr.msk.f32.vlgmr.msra.gmra.mxu0 %vm5025_vm3, %v2778_v59  ;;  %3419 = vmatprep.subr.mxu0 %v4969_v14  ;;  %vm5036_vm3 = vmmov %vm5031_vm0 }
 0x355   : > { %3363 = vmatprep.mubr.msk.f32.mxu0 %vm5026_vm11, %v2779_v61  ;;  %vm5039_vm11 = vmmov %vm5031_vm0  ;;  %3420 = vmatpush3.msra.mxu0 %v2270_v13 }
 0x356   : > { %3421 = vmatprep.subr.mxu0 %v4969_v14  ;;  %vm5048_vm8 = vmmov %vm5036_vm3 }
 0x357   : > { %3422 = vmatpush3.msra.mxu0 %v2269_v15  ;;  %vm5054_vm10 = vmmov %vm5036_vm3 }
 0x358   : > { %3364 = vmatmul.mubr.msk.f32.gmra.mxu0 %vm5027_vm12, %v2780_v62  ;;  %vm5040_vm12 = vmmov %vm5031_vm0  ;;  %3423 = vmatprep.subr.mxu0 %v4969_v14  ;;  %v1824_v62 = vpop.f32.mrf.mxu1 }
 0x359   : > { %3366 = vmatprep.mubr.msk.f32.mxu0 %vm5028_vm4, %v2781_v63  ;;  %vm5041_vm4 = vmmov %vm5031_vm0  ;;  %3424 = vmatpush3.msra.mxu0 %v2268_v18 }
 0x35a   : > { %3425 = vmatprep.subr.mxu0 %v4969_v14 }
 0x35b   : > { %3426 = vmatpush3.msra.mxu0 %v2267_v19 }
 0x35c   : > { %3367 = vmatmul.mubr.msk.f32.gmra.mxu0 %vm5029_vm15, %v2782_v0  ;;  %vm5042_vm15 = vmmov %vm5031_vm0  ;;  %3427 = vmatprep.subr.mxu0 %v4969_v14 }
 0x35d   : > { %3369 = vmatprep.mubr.msk.f32.mxu0 %vm5030_vm9, %v2783_v38  ;;  %vm5043_vm9 = vmmov %vm5031_vm0  ;;  %3428 = vmatpush3.msra.mxu0 %v2266_v21  ;;  %v3351_v38 = vpop.f32.mrf.mxu1 }
 0x35e   : > { %3429 = vmatprep.subr.mxu0 %v4969_v14 }
 0x35f   : > { %3430 = vmatpush3.msra.mxu0 %v2265_v22 }
 0x360   : > { %3370 = vmatmul.mubr.msk.f32.gmra.mxu0 %vm5031_vm0, %v2784_v3  ;;  %vm5044_vm0 = vmmov 0   ;;  %3431 = vmatprep.subr.mxu0 %v4969_v14 }
 0x361   : > { %3372 = vmatprep.mubr.msk.f32.mxu0 %vm5032_vm7, %v2785_v4  ;;  %3432 = vmatpush3.msra.mxu0 %v2264_v25 }
 0x362   : > { %3433 = vmatprep.subr.mxu0 %v4969_v14 }
 0x363   : > { %3434 = vmatpush3.msra.mxu0 %v2263_v26 }
 0x364   : > { %3373 = vmatmul.mubr.msk.f32.gmra.mxu0 %vm5035_vm14, %v2786_v5  ;;  %3435 = vmatprep.subr.mxu0 %v4969_v14  ;;  %v1834_v5 = vpop.f32.mrf.mxu1 }
 0x365   : > { %3375 = vmatprep.mubr.msk.f32.mxu0 %vm5036_vm3, %v2787_v37  ;;  %3436 = vmatpush3.msra.mxu0 %v2262_v28 }
 0x366   : > { %3437 = vmatprep.subr.mxu0 %v4969_v14 }
 0x367   : > { %3438 = vmatpush3.msra.mxu0 %v2261_v29 }
 0x368   : > { %3376 = vmatmul.mubr.msk.f32.gmra.mxu0 %vm5039_vm11, %v2788_v6  ;;  %3439 = vmatprep.subr.mxu0 %v4969_v14 }
 0x369   : > { %3378 = vmatprep.mubr.msk.f32.mxu0 %vm5040_vm12, %v2789_v7  ;;  %3440 = vmatpush3.msra.mxu0 %v2260_v31  ;;  %v3354_v7 = vpop.f32.mrf.mxu1 }
 0x36a   : > { %3441 = vmatprep.subr.mxu0 %v4969_v14 }
 0x36b   : > { %3442 = vmatpush3.msra.mxu0 %v2259_v32 }
 0x36c   : > { %3379 = vmatmul.mubr.msk.f32.gmra.mxu0 %vm5041_vm4, %v2790_v8  ;;  %3443 = vmatprep.subr.mxu0 %v4969_v14 }
 0x36d   : > { %3381 = vmatprep.mubr.msk.f32.mxu0 %vm5042_vm15, %v2791_v9  ;;  %3444 = vmatpush3.msra.mxu0 %v2258_v34 }
 0x36e   : > { %3445 = vmatprep.subr.mxu0 %v4969_v14 }
 0x36f   : > { %3446 = vmatpush3.msra.mxu0 %v2257_v36 }
 0x370   : > { %3382 = vmatmul.mubr.msk.f32.gmra.mxu0 %vm5043_vm9, %v2792_v10  ;;  %3447 = vmatprep.subr.mxu0 %v4969_v14  ;;  %v1844_v10 = vpop.f32.mrf.mxu1 }
 0x371   : > { %3451 = vmatprep.mubr.msk.f32.mxu0 %vm5044_vm0, %v4969_v14  ;;  %3448 = vmatpush3.msra.mxu0 %v2256_v40 }
 0x372   : > { %3449 = vmatprep.subr.mxu0 %v4969_v14  ;;  %v3357_v19 = vpop.f32.mrf.mxu1 }
 0x374   : > { %v1854_v32 = vpop.f32.mrf.mxu1 }
 0x414   : > { %v4715_v41 = vpop.f32.mrf.mxu0 }
 0x416   : > { %v4718_v59 = vpop.f32.mrf.mxu0 }
 0x418   : > { %v3365_v61 = vpop.f32.mrf.mxu0 }
 0x41a   : > { %v1988_v63 = vpop.f32.mrf.mxu0 }
 0x41c   : > { %v3368_v0 = vpop.f32.mrf.mxu0 }
 0x41e   : > { %v1998_v3 = vpop.f32.mrf.mxu0 }
 0x420   : > { %v3371_v4 = vpop.f32.mrf.mxu0 }
 0x422   : > { %v2008_v37 = vpop.f32.mrf.mxu0 }
 0x424   : > { %v3374_v6 = vpop.f32.mrf.mxu0 }
 0x425   : > { %v2024_v2 = vadd.f32 %v3374_v6, %v3348_v57  ;;  %v1999_v57 = vadd.f32 %v1998_v3, %v4693_v30 }
 0x426   : > { %v2018_v8 = vpop.f32.mrf.mxu0 }
 0x427   : > { %v2019_v60 = vadd.f32 %v2018_v8, %v1824_v62 }
 0x428   : > { %v3377_v9 = vpop.f32.mrf.mxu0 }
 0x429   : > { %v2034_v22 = vadd.f32 %v3377_v9, %v3351_v38  ;;  %v2014_v38 = vadd.f32 %v3371_v4, %v3345_v33  ;;  %v2823_v9 = vmul.f32 -1.442695, %v2024_v2  ;;  %v1989_v2 = vadd.f32 %v1988_v63, %v4673_v24 }
 0x42a   : > { %v2028_v13 = vpop.f32.mrf.mxu0 }
 0x42b   : > { %v2029_v34 = vadd.f32 %v2028_v13, %v1834_v5  ;;  %v2825_v40 = vmul.f32 -1.442695, %v2034_v22  ;;  %v1994_v5 = vadd.f32 %v3365_v61, %v4663_v20  ;;  %v2004_v13 = vadd.f32 %v3368_v0, %v4683_v27 }
 0x42c   : > { %v3380_v15 = vpop.f32.mrf.mxu0  ;;  %v1984_v20 = vadd.f32 %v4715_v41, %v4644_v11  ;;  %v1979_v0 = vadd.f32 %v4718_v59, %v4653_v17  ;;  %v2816_v3 = vmul.f32 -1.442695, %v1989_v2 }
 0x42d   : > { %v2044_v18 = vadd.f32 %v3380_v15, %v3354_v7  ;;  %v2824_v7 = vmul.f32 -1.442695, %v2029_v34  ;;  %v2822_v15 = vmul.f32 -1.442695, %v2019_v60 }
 0x42e   : > { %v2038_v21 = vpop.f32.mrf.mxu0  ;;  %v2814_v41 = vmul.f32 -1.442695, %v1979_v0 }
 0x42f   : > { %v2827_v25 = vmul.f32 -1.442695, %v2044_v18  ;;  %v2039_v26 = vadd.f32 %v2038_v21, %v1844_v10  ;;  %v2009_v10 = vadd.f32 %v2008_v37, %v1814_v39  ;;  %v2821_v18 = vmul.f32 -1.442695, %v2014_v38 }
 0x430   : > { %v3383_v28 = vpop.f32.mrf.mxu0  ;;  %v2815_v37 = vmul.f32 -1.442695, %v1984_v20 }
 0x431   : > { %v2826_v29 = vmul.f32 -1.442695, %v2039_v26  ;;  %v2054_v31 = vadd.f32 %v3383_v28, %v3357_v19  ;;  %3554 = vpow2.f32 %v2827_v25  ;;  %v2820_v6 = vmul.f32 -1.442695, %v2009_v10 }
 0x432   : > { %v2048_v36 = vpop.f32.mrf.mxu0 }
 0x433   : > { %v2829_v16 = vmul.f32 -1.442695, %v2054_v31  ;;  %v2049_v14 = vadd.f32 %v2048_v36, %v1854_v32  ;;  %3556 = vpow2.f32 %v2826_v29 }
 0x435   : > { %v2828_v23 = vmul.f32 -1.442695, %v2049_v14  ;;  %3558 = vpow2.f32 %v2829_v16  ;;  %v2817_v14 = vmul.f32 -1.442695, %v1994_v5  ;;  %v2819_v16 = vmul.f32 -1.442695, %v2004_v13 }
 0x436   : > { %3560 = vpow2.f32 %v2825_v40  ;;  %v5045_v13 = vmov 0.0  }
 0x437   : > { %3562 = vpow2.f32 %v2828_v23  ;;  %v2818_v23 = vmul.f32 -1.442695, %v1999_v57 }
 0x438   : > { %3564 = vpow2.f32 %v2824_v7 }
 0x439   : > { %3566 = vpow2.f32 %v2823_v9 }
 0x43a   : > { %3568 = vpow2.f32 %v2822_v15 }
 0x43b   : > { %3570 = vpow2.f32 %v2821_v18 }
 0x43c   : > { %3572 = vpow2.f32 %v2820_v6 }
 0x43d   : > { %3574 = vpow2.f32 %v2817_v14 }
 0x43e   : > { %v3555_v62 = vpop.eup %3554  ;;  %3576 = vpow2.f32 %v2819_v16 }
 0x43f   : > { %v2118_v27 = vadd.f32 1.0, %v3555_v62  ;;  %3578 = vpow2.f32 %v2818_v23 }
 0x440   : > { %v3557_v33 = vpop.eup %3556 }
 0x441   : > { %v2117_v4 = vadd.f32 1.0, %v3557_v33 }
 0x442   : > { %v3559_v60 = vpop.eup %3558 }
 0x443   : > { %v3561_v39 = vpop.eup %3560  ;;  %v2120_v30 = vadd.f32 1.0, %v3559_v60 }
 0x444   : > { %v3563_v61 = vpop.eup %3562  ;;  %v2116_v8 = vadd.f32 1.0, %v3561_v39 }
 0x445   : > { %3580 = vrcp.f32 %v2120_v30  ;;  %v2119_v24 = vadd.f32 1.0, %v3563_v61  ;;  %v3565_v63 = vpop.eup %3564 }
 0x446   : > { %3582 = vrcp.f32 %v2118_v27  ;;  %v3567_v11 = vpop.eup %3566  ;;  %v2115_v19 = vadd.f32 1.0, %v3565_v63 }
 0x447   : > { %3584 = vrcp.f32 %v2119_v24  ;;  %v3569_v21 = vpop.eup %3568  ;;  %v2114_v22 = vadd.f32 1.0, %v3567_v11  ;;  %v2248_v11 = vld [vmem:[%s4944_s10 + $0x48] sm:$0xff] }
 0x448   : > { %3586 = vpow2.f32 %v2816_v3  ;;  %v3571_v17 = vpop.eup %3570  ;;  %v2113_v59 = vadd.f32 1.0, %v3569_v21  ;;  %v2245_v21 = vld [vmem:[%s4944_s10 + $0x30] sm:$0xff] }
 0x449   : > { %3588 = vrcp.f32 %v2117_v4  ;;  %v3573_v25 = vpop.eup %3572  ;;  %v2112_v28 = vadd.f32 1.0, %v3571_v17  ;;  %v2243_v17 = vld [vmem:[%s4944_s10 + $0x20] sm:$0xff] }
 0x44a   : > { %3590 = vpow2.f32 %v2815_v37  ;;  %v3575_v26 = vpop.eup %3574  ;;  %v2111_v32 = vadd.f32 1.0, %v3573_v25  ;;  %v5046_v37 = vmov 1.0   ;;  %v2241_v25 = vld [vmem:[%s4944_s10 + $0x10] sm:$0xff] }
 0x44b   : > { %3592 = vrcp.f32 %v2116_v8  ;;  %v3577_v29 = vpop.eup %3576  ;;  %v2108_v57 = vadd.f32 1.0, %v3575_v26  ;;  %v2249_v8 = vld [vmem:[%s4944_s10 + $0x50] sm:$0xff]  ;;  %v2240_v26 = vld [vmem:[%s4944_s10 + $0x8] sm:$0xff] }
 0x44c   : > { %3594 = vpow2.f32 %v2814_v41  ;;  %v3579_v31 = vpop.eup %3578  ;;  %v2110_v40 = vadd.f32 1.0, %v3577_v29  ;;  %v2247_v41 = vld [vmem:[%s4944_s10 + $0x40] sm:$0xff] }
 0x44d   : > { %3596 = vrcp.f32 %v2115_v19  ;;  %v2109_v10 = vadd.f32 1.0, %v3579_v31  ;;  %v2246_v19 = vld [vmem:[%s4944_s10 + $0x38] sm:$0xff]  ;;  %v3624_v29 = vld [vmem:[%s3903_s20] sm:$0xff]  ;;  %s5056_s20 = sld [smem:[#allocation23_spill]] }
 0x44e   : > { %3598 = vrcp.f32 %v2114_v22  ;;  %v2244_v22 = vld [vmem:[%s4944_s10 + $0x28] sm:$0xff]  ;;  %v2255_v31 = vld [vmem:[%s4945_s11] sm:$0xff] }
 0x44f   : > { %3600 = vrcp.f32 %v2113_v59  ;;  %v2242_v59 = vld [vmem:[%s4944_s10 + $0x18] sm:$0xff]  ;;  %3450 = vmatpush3.msra.mxu0 %v2255_v31 }
 0x450   : > { %3602 = vrcp.f32 %v2112_v28  ;;  %v2239_v28 = vld [vmem:[%s4944_s10] sm:$0xff] }
 0x451   : > { %3604 = vrcp.f32 %v2111_v32 }
 0x452   : > { %v3581_v34 = vpop.eup %3580  ;;  %3606 = vrcp.f32 %v2110_v40 }
 0x453   : > { %v3583_v36 = vpop.eup %3582  ;;  %v2168_v7 = vmul.f32 %v3581_v34, %v4087_v56  ;;  %3608 = vrcp.f32 %v2109_v10  ;;  %s4866_s21 = scalar_lea.hbm %s5056_s20, %s2839_s29 }
 0x454   : > { %v3585_v38 = vpop.eup %3584  ;;  %v2166_v6 = vmul.f32 %v3583_v36, %v4083_v54  ;;  %3610 = vrcp.f32 %v2108_v57 }
 0x455   : > { %v3587_v9 = vpop.eup %3586  ;;  %3385 = vmatpush3.msra.mxu1 %v2168_v7  ;;  %v2167_v15 = vmul.f32 %v3585_v38, %v4092_v58  ;;  %v2832_v7 = vld [vmem:[%s551_s14] ss:$0 sm:$0xff]  ;;  %s5057_s14 = smov %s5056_s20 }
 0x456   : > { %v3589_v5 = vpop.eup %3588  ;;  %3386 = vmatprep.subr.mxu1 %v5045_v13  ;;  %v2107_v62 = vadd.f32 1.0, %v3587_v9  ;;  %vm2430_vm2 = vcmp.eq.s32.totalorder %v4120_v1, %v2832_v7  ;;  %v5049_v9 = vld [vmem:[#allocation19_spill] sm:$0xff]  ;;  %v2831_v1 = vld [vmem:[%s5050_s23] ss:$0 sm:$0xff]  ;;  %s3627_s23 = scalar_lea.vmem %s2554_s15, 128 }
 0x457   : > { %v3591_v18 = vpop.eup %3590  ;;  %3387 = vmatpush3.msra.mxu1 %v2167_v15  ;;  %v2165_v16 = vmul.f32 %v3589_v5, %v4085_v55  ;;  %v2833_v38 = vsel %vm2430_vm2, 1.0, %v5045_v13  ;;  %v1592_v10 = vadd.f32 %v5049_v9, %v4576_v35  ;;  %v2795_v15 = vld [vmem:[%s4940_s6] ss:$0 sm:$0xff]  ;;  %p3628_p12 = scmp.ne.s32.totalorder %s2554_s15, %s3627_s23 }
 0x458   : > { %v3593_v14 = vpop.eup %3592  ;;  %3388 = vmatprep.subr.mxu1 %v5045_v13  ;;  %v2106_v58 = vadd.f32 1.0, %v3591_v18  ;;  %3612 = vrcp.f32 %v2107_v62 }
 0x459   : > { %v3595_v56 = vpop.eup %3594  ;;  %3389 = vmatpush3.msra.mxu1 %v2166_v6  ;;  %v2164_v23 = vmul.f32 %v3593_v14, %v4079_v52  ;;  %v1602_v5 = vadd.f32 %v2795_v15, %v1592_v10  ;;  %p3629_p13 = pnand %p3628_p12, %p3879_p5 }
 0x45a   : > { %v3597_v2 = vpop.eup %3596  ;;  %3390 = vmatprep.subr.mxu1 %v5045_v13  ;;  %v2105_v54 = vadd.f32 1.0, %v3595_v56  ;;  %3614 = vrcp.f32 %v2106_v58 }
 0x45b   : > { %3391 = vmatpush3.msra.mxu1 %v2165_v16  ;;  %v3599_v33 = vpop.eup %3598  ;;  %v2163_v60 = vmul.f32 %v3597_v2, %v4081_v53  ;;  %v2796_v18 = vmul.f32 -1.442695, %v1602_v5  ;;  %p3630_p0 = pneg %p3629_p13 }
 0x45c   : > { %3392 = vmatprep.subr.mxu1 %v5045_v13  ;;  %v3601_v20 = vpop.eup %3600  ;;  %v2162_v55 = vmul.f32 %v3599_v33, %v4075_v50  ;;  %3616 = vrcp.f32 %v2105_v54 }
 0x45d   : > { %3393 = vmatpush3.msra.mxu1 %v2164_v23  ;;  %v3603_v27 = vpop.eup %3602  ;;  %v2161_v52 = vmul.f32 %v3601_v20, %v4077_v51  ;;  %3618 = vpow2.f32 %v2796_v18  ;;  %v5051_v23 = vld [vmem:[#allocation18_spill] sm:$0xff] }
 0x45e   : > { %3394 = vmatprep.subr.mxu1 %v5045_v13  ;;  %v3605_v39 = vpop.eup %3604  ;;  %v2160_v53 = vmul.f32 %v3603_v27, %v4071_v48 }
 0x45f   : > { %3395 = vmatpush3.msra.mxu1 %v2163_v60  ;;  %v3607_v30 = vpop.eup %3606  ;;  %v2159_v61 = vmul.f32 %v3605_v39, %v4073_v49  ;;  %v5052_v60 = vld [vmem:[#allocation20_spill] sm:$0xff] }
 0x460   : > { %3396 = vmatprep.subr.mxu1 %v5045_v13  ;;  %v3609_v50 = vpop.eup %3608  ;;  %v2158_v0 = vmul.f32 %v3607_v30, %v4067_v46  ;;  %vm2431_vm7 = vcmp.eq.s32.totalorder %v5052_v60, %v2832_v7 }
 0x461   : > { %3397 = vmatpush3.msra.mxu1 %v2162_v55  ;;  %v3611_v3 = vpop.eup %3610  ;;  %v2157_v51 = vmul.f32 %v3609_v50, %v4069_v47  ;;  %v2834_v55 = vsel %vm2431_vm7, 1.0, %v5045_v13 }
 0x462   : > { %3398 = vmatprep.subr.mxu1 %v5045_v13  ;;  %v2156_v48 = vmul.f32 %v3611_v3, %v4063_v44  ;;  %v2254_v44 = vld [vmem:[%s4944_s10 + $0x78] sm:$0xff] }
 0x463   : > { %3399 = vmatpush3.msra.mxu1 %v2161_v52 }
 0x464   : > { %3400 = vmatprep.subr.mxu1 %v5045_v13 }
 0x465   : > { %3401 = vmatpush3.msra.mxu1 %v2160_v53  ;;  %v3613_v4 = vpop.eup %3612 }
 0x466   : > { %3402 = vmatprep.subr.mxu1 %v5045_v13  ;;  %v2155_v49 = vmul.f32 %v3613_v4, %v4065_v45  ;;  %v2251_v45 = vld [vmem:[%s4944_s10 + $0x60] sm:$0xff] }
 0x467   : > { %3403 = vmatpush3.msra.mxu1 %v2159_v61  ;;  %v3615_v24 = vpop.eup %3614 }
 0x468   : > { %3404 = vmatprep.subr.mxu1 %v5045_v13  ;;  %v2154_v46 = vmul.f32 %v3615_v24, %v4059_v42  ;;  %v2253_v42 = vld [vmem:[%s4944_s10 + $0x70] sm:$0xff] }
 0x469   : > { %3405 = vmatpush3.msra.mxu1 %v2158_v0  ;;  %v3617_v63 = vpop.eup %3616 }
 0x46a   : > { %3406 = vmatprep.subr.mxu1 %v5045_v13  ;;  %v2153_v47 = vmul.f32 %v3617_v63, %v4061_v43  ;;  %v2252_v43 = vld [vmem:[%s4944_s10 + $0x68] sm:$0xff]  ;;  %v3619_v57 = vpop.eup %3618 }
 0x46b   : > { %3407 = vmatpush3.msra.mxu1 %v2157_v51  ;;  %v1606_v6 = vadd.f32 1.0, %v3619_v57 }
 0x46c   : > { %3408 = vmatprep.subr.mxu1 %v5045_v13 }
 0x46d   : > { %3409 = vmatpush3.msra.mxu1 %v2156_v48  ;;  %3620 = vrcp.f32 %v1606_v6 }
 0x46e   : > { %3410 = vmatprep.subr.mxu1 %v5045_v13 }
 0x46f   : > { %3411 = vmatpush3.msra.mxu1 %v2155_v49 }
 0x470   : > { %3412 = vmatprep.subr.mxu1 %v5045_v13 }
 0x471   : > { %3413 = vmatpush3.msra.mxu1 %v2154_v46 }
 0x472   : > { %3414 = vmatprep.subr.mxu1 %v5045_v13 }
 0x473   : > { %3415 = vmatpush3.msra.mxu1 %v2153_v47 }
 0x474   : > { %3417 = vmatmul.mubr.msk.f32.vlgmr.msra.gmra.mxu1 %vm5047_vm5, %v5046_v37  ;;  %3454 = vmatprep.subr.mxu1 %v5045_v13 }
 0x475   : > { %3455 = vmatpush3.msra.mxu1 %v2254_v44  ;;  %3486 = vmatprep.mubr.msk.f32.mxu1 %vm5044_vm0, %v5045_v13 }
 0x476   : > { %3456 = vmatprep.subr.mxu1 %v5045_v13 }
 0x477   : > { %3457 = vmatpush3.msra.mxu1 %v2253_v42 }
 0x478   : > { %3458 = vmatprep.subr.mxu1 %v5045_v13 }
 0x479   : > { %3459 = vmatpush3.msra.mxu1 %v2252_v43 }
 0x47a   : > { %3460 = vmatprep.subr.mxu1 %v5045_v13  ;;  %v3621_v16 = vpop.eup %3620 }
 0x47b   : > { %3461 = vmatpush3.msra.mxu1 %v2251_v45  ;;  %v2420_v2 = vsub.f32 1.0, %v3621_v16 }
 0x47c   : > { %3462 = vmatprep.subr.mxu1 %v5045_v13 }
 0x47d   : > { %3463 = vmatpush3.msra.mxu1 %v2250_v12  ;;  %v2421_v33 = vmul.f32 %v2420_v2, %v5051_v23 }
 0x47e   : > { %3464 = vmatprep.subr.mxu1 %v5045_v13 }
 0x47f   : > { %3465 = vmatpush3.msra.mxu1 %v2249_v8 }
 0x480   : > { %3466 = vmatprep.subr.mxu1 %v5045_v13 }
 0x481   : > { %3467 = vmatpush3.msra.mxu1 %v2248_v11 }
 0x482   : > { %3468 = vmatprep.subr.mxu1 %v5045_v13 }
 0x483   : > { %3469 = vmatpush3.msra.mxu1 %v2247_v41 }
 0x484   : > { %3470 = vmatprep.subr.mxu1 %v5045_v13 }
 0x485   : > { %3471 = vmatpush3.msra.mxu1 %v2246_v19 }
 0x486   : > { %3472 = vmatprep.subr.mxu1 %v5045_v13 }
 0x487   : > { %3473 = vmatpush3.msra.mxu1 %v2245_v21 }
 0x488   : > { %3474 = vmatprep.subr.mxu1 %v5045_v13 }
 0x489   : > { %3475 = vmatpush3.msra.mxu1 %v2244_v22 }
 0x48a   : > { %3476 = vmatprep.subr.mxu1 %v5045_v13 }
 0x48b   : > { %3477 = vmatpush3.msra.mxu1 %v2243_v17 }
 0x48c   : > { %3478 = vmatprep.subr.mxu1 %v5045_v13 }
 0x48d   : > { %3479 = vmatpush3.msra.mxu1 %v2242_v59 }
 0x48e   : > { %3480 = vmatprep.subr.mxu1 %v5045_v13 }
 0x48f   : > { %3481 = vmatpush3.msra.mxu1 %v2241_v25 }
 0x490   : > { %3482 = vmatprep.subr.mxu1 %v5045_v13 }
 0x491   : > { %3483 = vmatpush3.msra.mxu1 %v2240_v26 }
 0x492   : > { %3484 = vmatprep.subr.mxu1 %v5045_v13 }
 0x493   : > { %3485 = vmatpush3.msra.mxu1 %v2239_v28 }
 0x494   : > { %3487 = vmatmul.mubr.f32.vlgmr.msra.gmra.mxu1 %v3624_v29 }
 0x534   : > { %v2235_v32 = vpop.f32.mrf.mxu1 }
 0x535   : > { %3452 = vmatmul.mubr.f32.vlgmr.msra.gmra.mxu0 %v2235_v32 }
 0x536   : > { %v3418_v34 = vpop.f32.mrf.mxu1  ;;  %3491 = vmatprep.mubr.msk.f32.mxu0 %vm5048_vm8, %v2833_v38 }
 0x554   : > { %v2407_v36 = vpop.f32.mrf.mxu1 }
 0x556   : > { %v3488_v40 = vpop.f32.mrf.mxu1 }
 0x5f5   : > { %v2337_v14 = vpop.f32.mrf.mxu0 }
 0x5f6   : > { %v2408_v56 = vadd.f32 %v2407_v36, %v2337_v14 }
 0x5f7   : > { %v3453_v62 = vpop.f32.mrf.mxu0 }
 0x5f8   : > { %v2418_v35 = vadd.f32 %v2831_v1, %v2408_v56 }
 0x5fa   : > { %3622 = vtanh.f32 %v2418_v35 }
 0x607   : > { %v3623_v58 = vpop.eup %3622 }
 0x608   : > { %v2422_v54 = vmul.f32 %v3623_v58, %v3621_v16 }
 0x60a   : > { %v2423_v20 = vadd.f32 %v2422_v54, %v2421_v33 }
 0x60c   : > { %3489 = vmatprep.subr.mxu0 %v2423_v20  ;;  %2424 = vst [vmem:[%s4973_s28] sm:$0xff] %v2423_v20  ;;  %s3752_s28 = smov [#allocation4]  }
 0x60d   : > { %3490 = vmatpush3.msra.mxu0 %v2423_v20  ;;  %s3631_s0 = sshll.u32 %s3752_s28, 4  ;;  %s3632_s0 = int_to_ptr.vmem [resolvable:$false] %s3631_s0 }
 0x60e   : > { %3492 = vmatmul.mubr.msk.f32.vlgmr.msra.gmra.mxu0 %vm5054_vm10, %v2834_v55  ;;  %s3633_s30 = scalar_lea.vmem %s3632_s0, 256  ;;  %p3634_p1 = scmp.lt.s32.totalorder %s2554_s15, %s3632_s0 }
 0x60f   : > { %p3635_p3 = scmp.lt.s32.totalorder %s3633_s30, %s3627_s23 }
 0x611   : > { %p3636_p4 = por %p3635_p3, %p3634_p1 }
 0x613   : > { %p3637_p7 = pnand %p3636_p4, %p3630_p0 }
 0x615   : > { %3640 = shalt.err (!%p3637_p7)
}
 0x616   : > { %s3641_s12 = scalar_lea.hbm %s4859_s13, 128  ;;  %s3645_s28 = scalar_lea.hbm %s5055_s26, 1024 }
 0x617   : > { %p3642_p8 = scmp.ne.s32.totalorder %s4859_s13, %s3641_s12  ;;  %p3646_p11 = scmp.lt.s32.totalorder %s4859_s13, %s5055_s26 }
 0x618   : > { %p3647_p12 = scmp.lt.s32.totalorder %s3645_s28, %s3641_s12 }
 0x619   : > { %p3643_p9 = pnand %p3642_p8, %p3879_p5 }
 0x61a   : > { %p3648_p13 = por %p3647_p12, %p3646_p11 }
 0x61b   : > { %p3644_p10 = pneg %p3643_p9 }
 0x61d   : > { %p3649_p0 = pnand %p3648_p13, %p3644_p10 }
 0x61f   : > { %3652 = shalt.err (!%p3649_p0)
}
 0x620   : > { %s5058_s0 = sld [smem:[#allocation11_spill]]  ;;  %s5059_s19 = scalar_lea.vmem [#allocation2], %s3893_s16 }
 0x621   : > { %3495 = dma.vmem_to_hbm [thread:$0]  (%p3879_p5), %s2554_s15, 128, %s4859_s13, %s2527_s17  }
 0x622   : > { %s2540_s20 = sshll.u32 %s5059_s19, 4  ;;  %s3753_s12 = smov [#allocation2]   ;;  %s2541_s20 = int_to_ptr.vmem [resolvable:$true] %s2540_s20 }
 0x623   : > { %s3653_s27 = scalar_lea.vmem %s2541_s20, 128  ;;  %s3657_s29 = sshll.u32 %s3753_s12, 4  ;;  %s3658_s29 = int_to_ptr.vmem [resolvable:$false] %s3657_s29 }
 0x624   : > { %p3654_p1 = scmp.ne.s32.totalorder %s2541_s20, %s3653_s27  ;;  %s3659_s28 = scalar_lea.vmem %s3658_s29, 256 }
 0x625   : > { %p3660_p7 = scmp.lt.s32.totalorder %s2541_s20, %s3658_s29  ;;  %p3661_p8 = scmp.lt.s32.totalorder %s3659_s28, %s3653_s27 }
 0x626   : > { %s5060_s23 = sand.u32 1, %s5058_s0   ;;  %p3655_p3 = pnand %p3654_p1, %p3879_p5 }
 0x627   : > { %s2522_s30 = scalar_lea.sflag [#allocation3], %s5060_s23  ;;  %p3662_p9 = por %p3661_p8, %p3660_p7 }
 0x628   : > { %p3656_p4 = pneg %p3655_p3 }
 0x62a   : > { %p3663_p10 = pnand %p3662_p9, %p3656_p4 }
 0x62c   : > { %3666 = shalt.err (!%p3663_p10)
}
 0x62d   : > { %s3667_s16 = scalar_lea.hbm %s4866_s21, 128  ;;  %s3671_s17 = scalar_lea.hbm %s5057_s14, 1024 }
 0x62e   : > { %p3668_p11 = scmp.ne.s32.totalorder %s4866_s21, %s3667_s16  ;;  %p3672_p0 = scmp.lt.s32.totalorder %s4866_s21, %s5057_s14 }
 0x62f   : > { %p3673_p1 = scmp.lt.s32.totalorder %s3671_s17, %s3667_s16 }
 0x630   : > { %p3669_p12 = pnand %p3668_p11, %p3879_p5 }
 0x631   : > { %p3674_p3 = por %p3673_p1, %p3672_p0 }
 0x632   : > { %p3670_p13 = pneg %p3669_p12 }
 0x634   : > { %p3675_p4 = pnand %p3674_p3, %p3670_p13 }
 0x636   : > { %3678 = shalt.err (!%p3675_p4)
}
 0x637   : > { %3494 = dma.vmem_to_hbm [thread:$0]  (%p3879_p5), %s2541_s20, 128, %s4866_s21, %s2522_s30   ;;  %v3625_v27 = vld [vmem:[#allocation6 + $0x8] sm:$0xff]  ;;  %v3626_v53 = vld [vmem:[#allocation6] sm:$0xff] }
 0x638   : > { %s3754_s0 = smov [#allocation6]  }
 0x639   : > { %s2563_s19 = sshll.u32 %s3754_s0, 4  ;;  %s2564_s19 = int_to_ptr.vmem [resolvable:$true] %s2563_s19 }
 0x63a   : > { %s3679_s23 = scalar_lea.vmem %s2564_s19, 256  ;;  %p3686_p10 = scmp.lt.s32.totalorder %s2564_s19, %s2564_s19 }
 0x63b   : > { %p3680_p7 = scmp.ne.s32.totalorder %s2564_s19, %s3679_s23  ;;  %p3687_p11 = scmp.lt.s32.totalorder %s3679_s23, %s3679_s23 }
 0x63d   : > { %p3681_p8 = pnand %p3680_p7, %p343_p2  ;;  %p3688_p12 = por %p3687_p11, %p3686_p10 }
 0x63f   : > { %p3682_p9 = pneg %p3681_p8 }
 0x641   : > { %p3689_p5 = pnand %p3688_p12, %p3682_p9 }
 0x6ce   : > { %v3493_v13 = vpop.f32.mrf.mxu0 }
 0x6cf   : > { %v2518_v52 = vadd.f32 %v3625_v27, %v3493_v13 }
 0x6d0   : > { %v2508_v39 = vpop.f32.mrf.mxu0 }
 0x6d1   : > { %2520 = vst [vmem:[#allocation6 + $0x8] sm:$0xff] %v2518_v52  ;;  %v2517_v30 = vadd.f32 %v3626_v53, %v2508_v39 }
 0x6d3   : > { %2519 = vst [vmem:[#allocation6] sm:$0xff] %v2517_v30 }
 0x6d4   : > { %3692 = shalt.err (!%p3689_p5)
}
 0x6d5   : > { %s3755_s24 = smov 128   ;;  %s3756_s21 = smov 8  }
 0x6d6   : > { %s5061_s27 = sld [smem:[#allocation25_spill]] }
 0x6dc   : > { %3497 = dma.vmem_to_hbm [thread:$0]  (%p343_p2), %s2564_s19, 256, %s5061_s27, [#allocation5], %s3755_s24, %s3755_s24, %s3756_s21  }
 0x6dd   : > { %3720 = dma.done.wait (%p343_p2), [#allocation5], 256  }
 0x6de   : > { %3722 = vsyncadd (%p343_p2), [#allocation5], 4294967040 }
 0x6df PF: > { %s5062_s12 = sld [smem:[#allocation13_spill]] }
 0x6e0   : > { %s5063_s29 = sld [smem:[#allocation10_spill]] }
 0x6e5   : > { %p3511_p13 = scmp.ge.s32.totalorder %s5062_s12, 2 }
 0x6e6   : > { %s2582_s16 = sand.u32 1, %s5063_s29  }
 0x6e7   : > { %p3503_p0 = pnand %p3511_p13, %p3883_p6  ;;  %s2583_s13 = scalar_lea.sflag [#allocation3], %s2582_s16 }
 0x6e9   : > { %p3504_p1 = pneg %p3503_p0 }
 0x6eb   : > { %3724 = dma.done.wait (%p3504_p1), %s2583_s13, 128  }
 0x6ec   : > { %3726 = vsyncadd (%p3504_p1), %s2583_s13, 4294967168  ;;  %s5065_s15 = sadd.s32 4294967294, %s5062_s12  }
 0x6ed   : > { %s2591_s17 = sand.u32 1, %s5065_s15  }
 0x6ee   : > { %s2592_s25 = scalar_lea.sflag [#allocation5], %s2591_s17 }
 0x6ef   : > { %3728 = dma.done.wait (%p3504_p1), %s2592_s25, 128  }
 0x6f0   : > { %3730 = vsyncadd (%p3504_p1), %s2592_s25, 4294967168  ;;  %s5066_s21 = sld [smem:[#allocation14_spill]] }
 0x6f1   : > { %s5067_s18 = sld [smem:[#allocation11_spill]] }
 0x6f2   : > { %s5068_s19 = sld [smem:[#allocation12_spill]] }
 0x6f3   : > { %s5069_s20 = sld [smem:[#allocation15_spill]] }
 0x6f6   : > { %p29_p2 = scmp.ge.s32.totalorder %s5066_s21, 10  }
 0x6f8   :  { %31 = sbr.rel (!%p29_p2) target bundleno = 11 (0xb), region = 145 }
 0x6fd   :  { %2597 = vsyncpa [#allocation3], 1 }
 0x6fe   :  { %2599 = vsyncpa [#allocation3 + $0x1], 1 }
 0x6ff   :  { %2600 = vsyncpa [#allocation5], 1 }
 0x700   :  { %2602 = vsyncpa [#allocation5 + $0x1], 1 }

</bundles_post_ra>
